<compile_context>
chip_gen: v5e
topology: v5e:2x2
jax: 0.10.0
libtpu: 0.0.40
codegen_flags: <defaults>
</compile_context>

<pallas_src>
import numpy as np

import jax
import jax.numpy as jnp
from jax.experimental import pallas as pl
from jax.experimental.pallas import tpu as pltpu

# ----------------------- small synthetic config -----------------------
B = 2            # batch
S = 8            # sequence length
D = 32           # hidden size (= Xattn dim)
H = 4            # attention heads
DH = D // H      # head dim
HD = H * DH      # inner dim
FF = 64          # intermediate size (inner_dim)
V = 128          # vocab size (lane-dense logits)
K = 4            # soft-prompt length
N_LAYERS = 2     # Llama decoder layers
ARR = (0,)       # layers that get a GatedCrossAttentionBlock
MAX_LEN = S
EPS_LN = 1e-5    # nn.LayerNorm default
EPS_RMS = 1e-6   # Llama RMSNorm
NEG = -1e30

# ------------- f32 "consts" slab layout: (CONST_ROWS, 128) -------------
CS_ROW = 0                      # rows [0,S): cols [0,2HD)=cos2, [2HD,4HD)=sin2 (q|k block)
MASK_ROW = S                    # rows [S, S+H*S):
                                #   cols [0,H*S)            head-stacked causal self mask
                                #   cols [H*S,H*S+H*K)      head-stacked cross mask
                                #   cols [H*S+H*K, +HD)     hmq: 0/1 head lane mask (q & self v)
HMX_ROW = MASK_ROW + H * S      # rows [.., +H*K): cols [0,HD) hmv: head lane mask for cross v
VEC_ROW = HMX_ROW + H * K       # rows [.., +NVEC): cols [0,D) per-channel vectors
NVEC = 5 + 2 * N_LAYERS         # xln_g, xln_b, xffln_g, xffln_b, final_rms, rms1[l], rms2[l]
CONST_ROWS = ((VEC_ROW + NVEC + 7) // 8) * 8
CONST_COLS = 128

# ------------- bf16 D-row misc slab: (D, WM_COLS) -------------
WM_LM = 0                       # lm_head (D, V)
WM_XQ = WM_LM + V               # xattn to_q (scale folded)
WM_XKV = WM_XQ + HD             # xattn to_kv (fused K|V)
WM_XO = WM_XKV + 2 * HD         # xattn to_out (tanh(attn_gate) folded)
WM_X1 = WM_XO + D               # xattn ff up-proj
WM_COLS = WM_X1 + FF

# ------------- bf16 decoder slab: (L, D, DA_COLS) -------------
DA_QKVR = 0                     # [q*scale | k | v | rot(q)*scale | rot(k)]  (D, 5*HD)
DA_WO = DA_QKVR + 5 * HD        # o_proj (HD == D here)
DA_GU = DA_WO + D               # [gate | up]  (D, 2*FF)
DA_COLS = DA_GU + 2 * FF

# ------------- bf16 FF-row slab: (L+1, FF, D): wd per layer, last = xattn w2 -------------


# ======================================================================
# Kernel: one batch element per grid step; whole forward stays in VMEM.
# ======================================================================
def lcirc_kernel(h_ref, sp_ref, consts_ref, wmisc_ref, deca_ref, wfd_ref, out_ref):
    f32, bf16 = jnp.float32, jnp.bfloat16

    h = h_ref[0].astype(f32)                                 # (S, D) residual stream, f32
    sp = sp_ref[0]                                           # (K, D) bf16 soft prompt

    # ---- hoist all small constants once (no per-layer re-broadcast) ----
    consts = consts_ref[...]
    cos2 = consts[CS_ROW:CS_ROW + S, 0:2 * HD]               # (S, 2*HD)
    sin2 = consts[CS_ROW:CS_ROW + S, 2 * HD:4 * HD]
    self_mask = consts[MASK_ROW:MASK_ROW + H * S, 0:H * S]                        # (H*S, H*S)
    cross_mask = consts[MASK_ROW:MASK_ROW + H * S, H * S:H * S + H * K]           # (H*S, H*K)
    hmq = consts[MASK_ROW:MASK_ROW + H * S, H * S + H * K:H * S + H * K + HD]     # (H*S, HD)
    hmv_x = consts[HMX_ROW:HMX_ROW + H * K, 0:HD]                                 # (H*K, HD)
    vec = consts[VEC_ROW:VEC_ROW + NVEC, 0:D]                                     # (NVEC, D)
    xln_g, xln_b = vec[0:1], vec[1:2]
    xffln_g, xffln_b = vec[2:3], vec[3:4]
    frms = vec[4:5]
    rms1 = [vec[5 + l:6 + l] for l in range(N_LAYERS)]
    rms2 = [vec[5 + N_LAYERS + l:6 + N_LAYERS + l] for l in range(N_LAYERS)]

    wmisc = wmisc_ref[...]                                   # (D, WM_COLS) bf16
    lm_w = wmisc[:, WM_LM:WM_LM + V]
    xwq = wmisc[:, WM_XQ:WM_XQ + HD]
    xwkv = wmisc[:, WM_XKV:WM_XKV + 2 * HD]
    xwo = wmisc[:, WM_XO:WM_XO + D]
    xw1 = wmisc[:, WM_X1:WM_X1 + FF]
    xw2 = wfd_ref[N_LAYERS]                                  # (FF, D) bf16

    def layernorm(x, g, b):
        mu = jnp.mean(x, axis=-1, keepdims=True)
        var = jnp.mean((x - mu) * (x - mu), axis=-1, keepdims=True)
        return (x - mu) * jax.lax.rsqrt(var + EPS_LN) * g + b

    def rmsnorm(x, w):
        return x * jax.lax.rsqrt(jnp.mean(x * x, axis=-1, keepdims=True) + EPS_RMS) * w

    def attention(q, k, v, mask, hm_v, wo_bf, rq):
        # Head-stacked block-diagonal attention: 2 matmuls for ALL heads.
        # q: (rq, HD) f32 (1/sqrt(DH) pre-folded); k, v: (rk, HD) f32.
        qt = (jnp.concatenate([q] * H, axis=0) * hmq).astype(bf16)      # (H*rq, HD) blk-diag
        kt = jnp.concatenate([k] * H, axis=0).astype(bf16)              # (H*rk, HD)
        vt = (jnp.concatenate([v] * H, axis=0) * hm_v).astype(bf16)     # (H*rk, HD) blk-diag
        s = jax.lax.dot_general(qt, kt, (((1,), (1,)), ((), ())),
                                preferred_element_type=f32) + mask      # (H*rq, H*rk) f32
        s = s - jnp.max(s, axis=-1, keepdims=True)
        p = jnp.exp(s)
        p = p * pl.reciprocal(jnp.sum(p, axis=-1, keepdims=True), approx=True)
        o_st = jnp.dot(p.astype(bf16), vt, preferred_element_type=f32)  # (H*rq, HD)
        o = o_st[0:rq]                                                  # collapse head-stacked
        for hh in range(1, H):                                          # rows (off-head lanes 0)
            o = o + o_st[hh * rq:(hh + 1) * rq]
        return jnp.dot(o.astype(bf16), wo_bf, preferred_element_type=f32)   # (rq, D)

    for l in range(N_LAYERS):
        # ---- GatedCrossAttentionBlock (tanh(gate)s folded into xwo / xw2) ----
        if l in ARR:
            xn = layernorm(h, xln_g, xln_b).astype(bf16)
            q = jnp.dot(xn, xwq, preferred_element_type=f32)            # (S, HD), scale folded
            kv = jnp.dot(sp, xwkv, preferred_element_type=f32)          # (K, 2*HD) fused K|V
            h = attention(q, kv[:, :HD], kv[:, HD:], cross_mask, hmv_x, xwo, S) + h
            hn = layernorm(h, xffln_g, xffln_b).astype(bf16)
            h1 = jnp.dot(hn, xw1, preferred_element_type=f32)
            h1 = (h1 * jax.nn.sigmoid(h1)).astype(bf16)                 # SiLU
            h = jnp.dot(h1, xw2, preferred_element_type=f32) + h

        # ---- Llama decoder layer: RMSNorm, RoPE causal self-attn, SwiGLU ----
        wl = deca_ref[l]                                                # (D, DA_COLS) bf16
        xn = rmsnorm(h, rms1[l]).astype(bf16)
        proj = jnp.dot(xn, wl[:, DA_QKVR:DA_QKVR + 5 * HD],
                       preferred_element_type=f32)                      # (S, 5*HD) fused
        qk = proj[:, 0:2 * HD] * cos2 + proj[:, 3 * HD:5 * HD] * sin2   # RoPE on q|k in one op
        vv = proj[:, 2 * HD:3 * HD]
        h = h + attention(qk[:, :HD], qk[:, HD:2 * HD], vv, self_mask, hmq,
                          wl[:, DA_WO:DA_WO + D], S)

        xn2 = rmsnorm(h, rms2[l]).astype(bf16)
        gu = jnp.dot(xn2, wl[:, DA_GU:DA_GU + 2 * FF],
                     preferred_element_type=f32)                        # (S, 2*FF) fused gate|up
        act = (gu[:, :FF] * jax.nn.sigmoid(gu[:, :FF]) * gu[:, FF:]).astype(bf16)
        h = h + jnp.dot(act, wfd_ref[l], preferred_element_type=f32)

    # ---- final RMSNorm + lm_head -> lane-dense (S, V=128) f32 logits ----
    xn = rmsnorm(h, frms).astype(bf16)
    logits = jnp.dot(xn, lm_w, preferred_element_type=f32)              # (S, V)
    out_ref[...] = logits[None, :, :]


# ======================================================================
# Parameter init (deterministic, synthetic) + host-side packing/folding
# ======================================================================
def init_params(key):
    def nrm(k, shape, scale=0.02):
        return np.asarray(jax.random.normal(k, shape, jnp.float32)) * scale

    keys = jax.random.split(key, 32)
    ki = iter(range(32))
    scale = DH ** (-0.5)

    # rotate_half as a signed block-diagonal permutation, folded into q/k weights:
    # rotate_half(x @ W) == x @ (W @ rot_bd), exact (+-1 column permutation).
    half = DH // 2
    rot1 = np.zeros((DH, DH), np.float32)
    for i in range(half):
        rot1[i + half, i] = -1.0
        rot1[i, i + half] = 1.0
    rot_bd = np.kron(np.eye(H, dtype=np.float32), rot1)                 # (HD, HD)

    p = {}
    p["embed"] = jnp.asarray(nrm(keys[next(ki)], (V, D)), jnp.bfloat16)

    # ---- GatedCrossAttentionBlock (gates init to 0.0 as in the reference) ----
    attn_gate, ff_gate = 0.0, 0.0
    xwq = nrm(keys[next(ki)], (D, HD)) * scale                          # scale folded
    xwkv = nrm(keys[next(ki)], (D, 2 * HD))
    xwo = nrm(keys[next(ki)], (HD, D)) * np.tanh(attn_gate)             # gate folded
    xw1 = nrm(keys[next(ki)], (D, FF))
    xw2 = nrm(keys[next(ki)], (FF, D)) * np.tanh(ff_gate)               # gate folded
    lm = nrm(keys[next(ki)], (D, V))

    wmisc = np.zeros((D, WM_COLS), np.float32)
    wmisc[:, WM_LM:WM_LM + V] = lm
    wmisc[:, WM_XQ:WM_XQ + HD] = xwq
    wmisc[:, WM_XKV:WM_XKV + 2 * HD] = xwkv
    wmisc[:, WM_XO:WM_XO + D] = xwo
    wmisc[:, WM_X1:WM_X1 + FF] = xw1
    p["wmisc"] = jnp.asarray(wmisc, jnp.bfloat16)

    # ---- Llama decoder layers, packed into one stacked slab per row-count ----
    deca = np.zeros((N_LAYERS, D, DA_COLS), np.float32)
    wfd = np.zeros((N_LAYERS + 1, FF, D), np.float32)
    for l in range(N_LAYERS):
        wq = nrm(keys[next(ki)], (D, HD)) * scale                       # scale folded into Q
        wk = nrm(keys[next(ki)], (D, HD))
        wv = nrm(keys[next(ki)], (D, HD))
        wo = nrm(keys[next(ki)], (HD, D))
        wg = nrm(keys[next(ki)], (D, FF))
        wu = nrm(keys[next(ki)], (D, FF))
        wd = nrm(keys[next(ki)], (FF, D))
        deca[l, :, DA_QKVR:DA_QKVR + 5 * HD] = np.concatenate(
            [wq, wk, wv, wq @ rot_bd, wk @ rot_bd], axis=1)             # fused q|k|v|rot(q)|rot(k)
        deca[l, :, DA_WO:DA_WO + D] = wo
        deca[l, :, DA_GU:DA_GU + FF] = wg
        deca[l, :, DA_GU + FF:DA_GU + 2 * FF] = wu
        wfd[l] = wd
    wfd[N_LAYERS] = xw2
    p["deca"] = jnp.asarray(deca, jnp.bfloat16)
    p["wfd"] = jnp.asarray(wfd, jnp.bfloat16)

    # ---- f32 constants slab ----
    consts = np.zeros((CONST_ROWS, CONST_COLS), np.float32)

    # RoPE cos/sin, tiled over heads and duplicated for the fused q|k block.
    inv_freq = 1.0 / (10000.0 ** (np.arange(0, DH, 2, dtype=np.float32) / DH))
    ang = np.arange(S, dtype=np.float32)[:, None] * inv_freq[None, :]   # (S, DH/2)
    cos = np.concatenate([np.cos(ang), np.cos(ang)], -1)                # (S, DH)
    sin = np.concatenate([np.sin(ang), np.sin(ang)], -1)
    consts[CS_ROW:CS_ROW + S, 0:2 * HD] = np.tile(cos, (1, 2 * H))
    consts[CS_ROW:CS_ROW + S, 2 * HD:4 * HD] = np.tile(sin, (1, 2 * H))

    # Head-stacked additive masks: diag head blocks = real mask, off-head blocks = -1e30.
    eyeH = np.eye(H, dtype=np.float32)
    causal = np.where(np.arange(S)[:, None] >= np.arange(S)[None, :], 0.0, NEG).astype(np.float32)
    self_mask = np.kron(eyeH, causal) + np.kron(1.0 - eyeH, np.full((S, S), NEG, np.float32))
    cross_mask = np.kron(1.0 - eyeH, np.full((S, K), NEG, np.float32))  # diag blocks = 0
    consts[MASK_ROW:MASK_ROW + H * S, 0:H * S] = self_mask
    consts[MASK_ROW:MASK_ROW + H * S, H * S:H * S + H * K] = cross_mask
    # 0/1 head lane masks for the block-diagonal Q / V construction.
    consts[MASK_ROW:MASK_ROW + H * S, H * S + H * K:H * S + H * K + HD] = \
        np.kron(eyeH, np.ones((S, DH), np.float32))                     # hmq (also self V)
    consts[HMX_ROW:HMX_ROW + H * K, 0:HD] = np.kron(eyeH, np.ones((K, DH), np.float32))

    # per-channel vectors: fresh-init LayerNorm/RMSNorm weights (1) and biases (0).
    consts[VEC_ROW + 0, 0:D] = 1.0      # xattn ln gamma
    consts[VEC_ROW + 1, 0:D] = 0.0      # xattn ln beta
    consts[VEC_ROW + 2, 0:D] = 1.0      # xattn ff ln gamma
    consts[VEC_ROW + 3, 0:D] = 0.0      # xattn ff ln beta
    consts[VEC_ROW + 4, 0:D] = 1.0      # final RMSNorm
    for l in range(N_LAYERS):
        consts[VEC_ROW + 5 + l, 0:D] = 1.0                  # input_layernorm
        consts[VEC_ROW + 5 + N_LAYERS + l, 0:D] = 1.0       # post_attention_layernorm
    p["consts"] = jnp.asarray(consts)
    return p


# ======================================================================
# LCIRC.forward
# ======================================================================
def lcirc_forward(input_ids, soft_prompt, params, max_len):
    hidden = params["embed"][input_ids]                      # (B, S, D) bf16 token embedding

    logits = pl.pallas_call(
        lcirc_kernel,
        out_shape=jax.ShapeDtypeStruct((B, S, V), jnp.float32),
        grid=(B,),                                           # batch-parallel (2 TCs on v7x)
        in_specs=[
            pl.BlockSpec((1, S, D), lambda b: (b, 0, 0)),                    # hidden (per batch)
            pl.BlockSpec((1, K, D), lambda b: (b, 0, 0)),                    # soft prompt
            pl.BlockSpec((CONST_ROWS, CONST_COLS), lambda b: (0, 0)),        # f32 consts slab
            pl.BlockSpec((D, WM_COLS), lambda b: (0, 0)),                    # misc bf16 weights
            pl.BlockSpec((N_LAYERS, D, DA_COLS), lambda b: (0, 0, 0)),       # decoder slab
            pl.BlockSpec((N_LAYERS + 1, FF, D), lambda b: (0, 0, 0)),        # FF-row slab
        ],
        out_specs=pl.BlockSpec((1, S, V), lambda b: (b, 0, 0)),
        compiler_params=pltpu.CompilerParams(dimension_semantics=("parallel",)),
    )(hidden, soft_prompt, params["consts"], params["wmisc"], params["deca"], params["wfd"])

    return logits[:, -max_len:-1]                            # (B, max_len-1, V) float32


if __name__ == "__main__":
    key = jax.random.PRNGKey(0)
    k_par, k_ids, k_sp = jax.random.split(key, 3)

    params = init_params(k_par)
    input_ids = jax.random.randint(k_ids, (B, S), 0, V, dtype=jnp.int32)
    soft_prompt = (jax.random.normal(k_sp, (B, K, D), jnp.float32) * 0.02).astype(jnp.bfloat16)

    out = lcirc_forward(input_ids, soft_prompt, params, MAX_LEN)
    out = jax.block_until_ready(out)
    assert out.shape == (B, MAX_LEN - 1, V) and out.dtype == jnp.float32
    assert bool(jnp.all(jnp.isfinite(out)))
    print("KERNEL_OK")
</pallas_src>

<mosaic_0001>
module attributes {stable_mosaic.version = 11 : i64} {
  func.func @lcirc_kernel(%arg0: i32, %arg1: memref<1x8x32xbf16, #tpu.memory_space<vmem>>, %arg2: memref<1x4x32xbf16, #tpu.memory_space<vmem>>, %arg3: memref<72x128xf32, #tpu.memory_space<vmem>>, %arg4: memref<32x320xbf16, #tpu.memory_space<vmem>>, %arg5: memref<2x32x320xbf16, #tpu.memory_space<vmem>>, %arg6: memref<3x64x32xbf16, #tpu.memory_space<vmem>>, %arg7: memref<1x8x128xf32, #tpu.memory_space<vmem>>) attributes {dimension_semantics = [#tpu.dimension_semantics<parallel>], iteration_bounds = array<i64: 2>, scalar_prefetch = 0 : i64, scratch_operands = 0 : i64, tpu.core_type = #tpu.core_type<tc>, window_params = [{transform_indices = @transform_0, window_bounds = array<i64: 1, 8, 32>}, {transform_indices = @transform_1, window_bounds = array<i64: 1, 4, 32>}, {pipeline_mode = #tpu.pipeline_mode<synchronous>, transform_indices = @transform_2, window_bounds = array<i64: 72, 128>}, {pipeline_mode = #tpu.pipeline_mode<synchronous>, transform_indices = @transform_3, window_bounds = array<i64: 32, 320>}, {pipeline_mode = #tpu.pipeline_mode<synchronous>, transform_indices = @transform_4, window_bounds = array<i64: 2, 32, 320>}, {pipeline_mode = #tpu.pipeline_mode<synchronous>, transform_indices = @transform_5, window_bounds = array<i64: 3, 64, 32>}, {transform_indices = @transform_6, window_bounds = array<i64: 1, 8, 128>}]} {
    %c0 = arith.constant 0 : index
    %c0_0 = arith.constant 0 : index
    %c0_1 = arith.constant 0 : index
    %0 = vector.load %arg1[%c0, %c0_0, %c0_1] : memref<1x8x32xbf16, #tpu.memory_space<vmem>>, vector<1x8x32xbf16>
    %1 = vector.shape_cast %0 : vector<1x8x32xbf16> to vector<8x32xbf16>
    %2 = arith.extf %1 : vector<8x32xbf16> to vector<8x32xf32>
    %c0_2 = arith.constant 0 : index
    %c0_3 = arith.constant 0 : index
    %c0_4 = arith.constant 0 : index
    %3 = vector.load %arg2[%c0_2, %c0_3, %c0_4] : memref<1x4x32xbf16, #tpu.memory_space<vmem>>, vector<1x4x32xbf16>
    %4 = vector.shape_cast %3 : vector<1x4x32xbf16> to vector<4x32xbf16>
    %c0_5 = arith.constant 0 : index
    %c0_6 = arith.constant 0 : index
    %5 = vector.load %arg3[%c0_5, %c0_6] : memref<72x128xf32, #tpu.memory_space<vmem>>, vector<72x128xf32>
    %6 = vector.extract_strided_slice %5 {offsets = [0, 0], sizes = [8, 64], strides = [1, 1]} : vector<72x128xf32> to vector<8x64xf32>
    %7 = vector.extract_strided_slice %5 {offsets = [0, 64], sizes = [8, 64], strides = [1, 1]} : vector<72x128xf32> to vector<8x64xf32>
    %8 = vector.extract_strided_slice %5 {offsets = [8, 0], sizes = [32, 32], strides = [1, 1]} : vector<72x128xf32> to vector<32x32xf32>
    %9 = vector.extract_strided_slice %5 {offsets = [8, 32], sizes = [32, 16], strides = [1, 1]} : vector<72x128xf32> to vector<32x16xf32>
    %10 = vector.extract_strided_slice %5 {offsets = [8, 48], sizes = [32, 32], strides = [1, 1]} : vector<72x128xf32> to vector<32x32xf32>
    %11 = vector.extract_strided_slice %5 {offsets = [40, 0], sizes = [16, 32], strides = [1, 1]} : vector<72x128xf32> to vector<16x32xf32>
    %12 = vector.extract_strided_slice %5 {offsets = [56, 0], sizes = [9, 32], strides = [1, 1]} : vector<72x128xf32> to vector<9x32xf32>
    %13 = vector.extract_strided_slice %12 {offsets = [0, 0], sizes = [1, 32], strides = [1, 1]} : vector<9x32xf32> to vector<1x32xf32>
    %14 = vector.extract_strided_slice %12 {offsets = [1, 0], sizes = [1, 32], strides = [1, 1]} : vector<9x32xf32> to vector<1x32xf32>
    %15 = vector.extract_strided_slice %12 {offsets = [2, 0], sizes = [1, 32], strides = [1, 1]} : vector<9x32xf32> to vector<1x32xf32>
    %16 = vector.extract_strided_slice %12 {offsets = [3, 0], sizes = [1, 32], strides = [1, 1]} : vector<9x32xf32> to vector<1x32xf32>
    %17 = vector.extract_strided_slice %12 {offsets = [4, 0], sizes = [1, 32], strides = [1, 1]} : vector<9x32xf32> to vector<1x32xf32>
    %18 = vector.extract_strided_slice %12 {offsets = [5, 0], sizes = [1, 32], strides = [1, 1]} : vector<9x32xf32> to vector<1x32xf32>
    %19 = vector.extract_strided_slice %12 {offsets = [6, 0], sizes = [1, 32], strides = [1, 1]} : vector<9x32xf32> to vector<1x32xf32>
    %20 = vector.extract_strided_slice %12 {offsets = [7, 0], sizes = [1, 32], strides = [1, 1]} : vector<9x32xf32> to vector<1x32xf32>
    %21 = vector.extract_strided_slice %12 {offsets = [8, 0], sizes = [1, 32], strides = [1, 1]} : vector<9x32xf32> to vector<1x32xf32>
    %c0_7 = arith.constant 0 : index
    %c0_8 = arith.constant 0 : index
    %22 = vector.load %arg4[%c0_7, %c0_8] : memref<32x320xbf16, #tpu.memory_space<vmem>>, vector<32x320xbf16>
    %23 = vector.extract_strided_slice %22 {offsets = [0, 0], sizes = [32, 128], strides = [1, 1]} : vector<32x320xbf16> to vector<32x128xbf16>
    %24 = vector.extract_strided_slice %22 {offsets = [0, 128], sizes = [32, 32], strides = [1, 1]} : vector<32x320xbf16> to vector<32x32xbf16>
    %25 = vector.extract_strided_slice %22 {offsets = [0, 160], sizes = [32, 64], strides = [1, 1]} : vector<32x320xbf16> to vector<32x64xbf16>
    %26 = vector.extract_strided_slice %22 {offsets = [0, 224], sizes = [32, 32], strides = [1, 1]} : vector<32x320xbf16> to vector<32x32xbf16>
    %27 = vector.extract_strided_slice %22 {offsets = [0, 256], sizes = [32, 64], strides = [1, 1]} : vector<32x320xbf16> to vector<32x64xbf16>
    %c2 = arith.constant 2 : index
    %c0_9 = arith.constant 0 : index
    %c0_10 = arith.constant 0 : index
    %28 = vector.load %arg6[%c2, %c0_9, %c0_10] : memref<3x64x32xbf16, #tpu.memory_space<vmem>>, vector<1x64x32xbf16>
    %29 = vector.shape_cast %28 : vector<1x64x32xbf16> to vector<64x32xbf16>
    %cst = arith.constant dense<0.000000e+00> : vector<8xf32>
    %30 = vector.multi_reduction <add>, %2, %cst [1] : vector<8x32xf32> to vector<8xf32>
    %31 = vector.shape_cast %30 : vector<8xf32> to vector<8x1xf32>
    %cst_11 = arith.constant 3.200000e+01 : f32
    %32 = vector.broadcast %cst_11 : f32 to vector<8x1xf32>
    %33 = arith.divf %31, %32 : vector<8x1xf32>
    %34 = vector.broadcast %33 : vector<8x1xf32> to vector<8x32xf32>
    %35 = arith.subf %2, %34 : vector<8x32xf32>
    %36 = vector.broadcast %33 : vector<8x1xf32> to vector<8x32xf32>
    %37 = arith.subf %2, %36 : vector<8x32xf32>
    %38 = arith.mulf %35, %37 : vector<8x32xf32>
    %cst_12 = arith.constant dense<0.000000e+00> : vector<8xf32>
    %39 = vector.multi_reduction <add>, %38, %cst_12 [1] : vector<8x32xf32> to vector<8xf32>
    %40 = vector.shape_cast %39 : vector<8xf32> to vector<8x1xf32>
    %cst_13 = arith.constant 3.200000e+01 : f32
    %41 = vector.broadcast %cst_13 : f32 to vector<8x1xf32>
    %42 = arith.divf %40, %41 : vector<8x1xf32>
    %43 = vector.broadcast %33 : vector<8x1xf32> to vector<8x32xf32>
    %44 = arith.subf %2, %43 : vector<8x32xf32>
    %cst_14 = arith.constant 9.99999974E-6 : f32
    %45 = vector.broadcast %cst_14 : f32 to vector<8x1xf32>
    %46 = arith.addf %42, %45 : vector<8x1xf32>
    %47 = math.rsqrt %46 : vector<8x1xf32>
    %48 = vector.broadcast %47 : vector<8x1xf32> to vector<8x32xf32>
    %49 = arith.mulf %44, %48 : vector<8x32xf32>
    %50 = vector.broadcast %13 : vector<1x32xf32> to vector<8x32xf32>
    %51 = arith.mulf %49, %50 : vector<8x32xf32>
    %52 = vector.broadcast %14 : vector<1x32xf32> to vector<8x32xf32>
    %53 = arith.addf %51, %52 : vector<8x32xf32>
    %54 = arith.truncf %53 : vector<8x32xf32> to vector<8x32xbf16>
    %cst_15 = arith.constant dense<0.000000e+00> : vector<8x32xf32>
    %55 = tpu.matmul %54, %24, %cst_15 {dimension_numbers = #tpu.dot_dimension_numbers<[1], [0], [0], [1], [0, 0, 1, 1], [], []>} : vector<8x32xbf16>, vector<32x32xbf16>, vector<8x32xf32> -> vector<8x32xf32>
    %cst_16 = arith.constant dense<0.000000e+00> : vector<4x64xf32>
    %56 = tpu.matmul %4, %25, %cst_16 {dimension_numbers = #tpu.dot_dimension_numbers<[1], [0], [0], [1], [0, 0, 1, 1], [], []>} : vector<4x32xbf16>, vector<32x64xbf16>, vector<4x64xf32> -> vector<4x64xf32>
    %57 = vector.extract_strided_slice %56 {offsets = [0, 0], sizes = [4, 32], strides = [1, 1]} : vector<4x64xf32> to vector<4x32xf32>
    %58 = vector.extract_strided_slice %56 {offsets = [0, 32], sizes = [4, 32], strides = [1, 1]} : vector<4x64xf32> to vector<4x32xf32>
    %59 = tpu.concatenate %55, %55, %55, %55 in 0 : vector<8x32xf32>, vector<8x32xf32>, vector<8x32xf32>, vector<8x32xf32> -> vector<32x32xf32>
    %60 = arith.mulf %59, %10 : vector<32x32xf32>
    %61 = arith.truncf %60 : vector<32x32xf32> to vector<32x32xbf16>
    %62 = tpu.concatenate %57, %57, %57, %57 in 0 : vector<4x32xf32>, vector<4x32xf32>, vector<4x32xf32>, vector<4x32xf32> -> vector<16x32xf32>
    %63 = arith.truncf %62 : vector<16x32xf32> to vector<16x32xbf16>
    %64 = tpu.concatenate %58, %58, %58, %58 in 0 : vector<4x32xf32>, vector<4x32xf32>, vector<4x32xf32>, vector<4x32xf32> -> vector<16x32xf32>
    %65 = arith.mulf %64, %11 : vector<16x32xf32>
    %66 = arith.truncf %65 : vector<16x32xf32> to vector<16x32xbf16>
    %cst_17 = arith.constant dense<0.000000e+00> : vector<32x16xf32>
    %67 = tpu.matmul %61, %63, %cst_17 {dimension_numbers = #tpu.dot_dimension_numbers<[1], [1], [0], [0], [0, 0, 1, 0], [], []>} : vector<32x32xbf16>, vector<16x32xbf16>, vector<32x16xf32> -> vector<32x16xf32>
    %68 = arith.addf %67, %9 : vector<32x16xf32>
    %cst_18 = arith.constant dense<0xFF800000> : vector<32xf32>
    %69 = vector.multi_reduction <maximumf>, %68, %cst_18 [1] : vector<32x16xf32> to vector<32xf32>
    %70 = vector.shape_cast %69 : vector<32xf32> to vector<32x1xf32>
    %71 = vector.broadcast %70 : vector<32x1xf32> to vector<32x16xf32>
    %72 = arith.subf %68, %71 : vector<32x16xf32>
    %73 = math.exp %72 : vector<32x16xf32>
    %cst_19 = arith.constant dense<0.000000e+00> : vector<32xf32>
    %74 = vector.multi_reduction <add>, %73, %cst_19 [1] : vector<32x16xf32> to vector<32xf32>
    %75 = vector.shape_cast %74 : vector<32xf32> to vector<32x1xf32>
    %76 = tpu.reciprocal %75 {approx = true} : vector<32x1xf32> -> vector<32x1xf32>
    %77 = vector.broadcast %76 : vector<32x1xf32> to vector<32x16xf32>
    %78 = arith.mulf %73, %77 : vector<32x16xf32>
    %79 = arith.truncf %78 : vector<32x16xf32> to vector<32x16xbf16>
    %cst_20 = arith.constant dense<0.000000e+00> : vector<32x32xf32>
    %80 = tpu.matmul %79, %66, %cst_20 {dimension_numbers = #tpu.dot_dimension_numbers<[1], [0], [0], [1], [0, 0, 1, 1], [], []>} : vector<32x16xbf16>, vector<16x32xbf16>, vector<32x32xf32> -> vector<32x32xf32>
    %81 = vector.extract_strided_slice %80 {offsets = [0, 0], sizes = [8, 32], strides = [1, 1]} : vector<32x32xf32> to vector<8x32xf32>
    %82 = vector.extract_strided_slice %80 {offsets = [8, 0], sizes = [8, 32], strides = [1, 1]} : vector<32x32xf32> to vector<8x32xf32>
    %83 = arith.addf %81, %82 : vector<8x32xf32>
    %84 = vector.extract_strided_slice %80 {offsets = [16, 0], sizes = [8, 32], strides = [1, 1]} : vector<32x32xf32> to vector<8x32xf32>
    %85 = arith.addf %83, %84 : vector<8x32xf32>
    %86 = vector.extract_strided_slice %80 {offsets = [24, 0], sizes = [8, 32], strides = [1, 1]} : vector<32x32xf32> to vector<8x32xf32>
    %87 = arith.addf %85, %86 : vector<8x32xf32>
    %88 = arith.truncf %87 : vector<8x32xf32> to vector<8x32xbf16>
    %cst_21 = arith.constant dense<0.000000e+00> : vector<8x32xf32>
    %89 = tpu.matmul %88, %26, %cst_21 {dimension_numbers = #tpu.dot_dimension_numbers<[1], [0], [0], [1], [0, 0, 1, 1], [], []>} : vector<8x32xbf16>, vector<32x32xbf16>, vector<8x32xf32> -> vector<8x32xf32>
    %90 = arith.addf %89, %2 : vector<8x32xf32>
    %cst_22 = arith.constant dense<0.000000e+00> : vector<8xf32>
    %91 = vector.multi_reduction <add>, %90, %cst_22 [1] : vector<8x32xf32> to vector<8xf32>
    %92 = vector.shape_cast %91 : vector<8xf32> to vector<8x1xf32>
    %cst_23 = arith.constant 3.200000e+01 : f32
    %93 = vector.broadcast %cst_23 : f32 to vector<8x1xf32>
    %94 = arith.divf %92, %93 : vector<8x1xf32>
    %95 = vector.broadcast %94 : vector<8x1xf32> to vector<8x32xf32>
    %96 = arith.subf %90, %95 : vector<8x32xf32>
    %97 = vector.broadcast %94 : vector<8x1xf32> to vector<8x32xf32>
    %98 = arith.subf %90, %97 : vector<8x32xf32>
    %99 = arith.mulf %96, %98 : vector<8x32xf32>
    %cst_24 = arith.constant dense<0.000000e+00> : vector<8xf32>
    %100 = vector.multi_reduction <add>, %99, %cst_24 [1] : vector<8x32xf32> to vector<8xf32>
    %101 = vector.shape_cast %100 : vector<8xf32> to vector<8x1xf32>
    %cst_25 = arith.constant 3.200000e+01 : f32
    %102 = vector.broadcast %cst_25 : f32 to vector<8x1xf32>
    %103 = arith.divf %101, %102 : vector<8x1xf32>
    %104 = vector.broadcast %94 : vector<8x1xf32> to vector<8x32xf32>
    %105 = arith.subf %90, %104 : vector<8x32xf32>
    %cst_26 = arith.constant 9.99999974E-6 : f32
    %106 = vector.broadcast %cst_26 : f32 to vector<8x1xf32>
    %107 = arith.addf %103, %106 : vector<8x1xf32>
    %108 = math.rsqrt %107 : vector<8x1xf32>
    %109 = vector.broadcast %108 : vector<8x1xf32> to vector<8x32xf32>
    %110 = arith.mulf %105, %109 : vector<8x32xf32>
    %111 = vector.broadcast %15 : vector<1x32xf32> to vector<8x32xf32>
    %112 = arith.mulf %110, %111 : vector<8x32xf32>
    %113 = vector.broadcast %16 : vector<1x32xf32> to vector<8x32xf32>
    %114 = arith.addf %112, %113 : vector<8x32xf32>
    %115 = arith.truncf %114 : vector<8x32xf32> to vector<8x32xbf16>
    %cst_27 = arith.constant dense<0.000000e+00> : vector<8x64xf32>
    %116 = tpu.matmul %115, %27, %cst_27 {dimension_numbers = #tpu.dot_dimension_numbers<[1], [0], [0], [1], [0, 0, 1, 1], [], []>} : vector<8x32xbf16>, vector<32x64xbf16>, vector<8x64xf32> -> vector<8x64xf32>
    %117 = arith.negf %116 : vector<8x64xf32>
    %118 = math.exp %117 : vector<8x64xf32>
    %cst_28 = arith.constant 1.000000e+00 : f32
    %119 = vector.broadcast %cst_28 : f32 to vector<8x64xf32>
    %120 = arith.addf %119, %118 : vector<8x64xf32>
    %121 = arith.divf %119, %120 : vector<8x64xf32>
    %122 = arith.mulf %116, %121 : vector<8x64xf32>
    %123 = arith.truncf %122 : vector<8x64xf32> to vector<8x64xbf16>
    %cst_29 = arith.constant dense<0.000000e+00> : vector<8x32xf32>
    %124 = tpu.matmul %123, %29, %cst_29 {dimension_numbers = #tpu.dot_dimension_numbers<[1], [0], [0], [1], [0, 0, 1, 1], [], []>} : vector<8x64xbf16>, vector<64x32xbf16>, vector<8x32xf32> -> vector<8x32xf32>
    %125 = arith.addf %124, %90 : vector<8x32xf32>
    %c0_30 = arith.constant 0 : index
    %c0_31 = arith.constant 0 : index
    %c0_32 = arith.constant 0 : index
    %126 = vector.load %arg5[%c0_30, %c0_31, %c0_32] : memref<2x32x320xbf16, #tpu.memory_space<vmem>>, vector<1x32x320xbf16>
    %127 = vector.shape_cast %126 : vector<1x32x320xbf16> to vector<32x320xbf16>
    %128 = arith.mulf %125, %125 : vector<8x32xf32>
    %cst_33 = arith.constant dense<0.000000e+00> : vector<8xf32>
    %129 = vector.multi_reduction <add>, %128, %cst_33 [1] : vector<8x32xf32> to vector<8xf32>
    %130 = vector.shape_cast %129 : vector<8xf32> to vector<8x1xf32>
    %cst_34 = arith.constant 3.200000e+01 : f32
    %131 = vector.broadcast %cst_34 : f32 to vector<8x1xf32>
    %132 = arith.divf %130, %131 : vector<8x1xf32>
    %cst_35 = arith.constant 9.99999997E-7 : f32
    %133 = vector.broadcast %cst_35 : f32 to vector<8x1xf32>
    %134 = arith.addf %132, %133 : vector<8x1xf32>
    %135 = math.rsqrt %134 : vector<8x1xf32>
    %136 = vector.broadcast %135 : vector<8x1xf32> to vector<8x32xf32>
    %137 = arith.mulf %125, %136 : vector<8x32xf32>
    %138 = vector.broadcast %18 : vector<1x32xf32> to vector<8x32xf32>
    %139 = arith.mulf %137, %138 : vector<8x32xf32>
    %140 = arith.truncf %139 : vector<8x32xf32> to vector<8x32xbf16>
    %141 = vector.extract_strided_slice %127 {offsets = [0, 0], sizes = [32, 160], strides = [1, 1]} : vector<32x320xbf16> to vector<32x160xbf16>
    %cst_36 = arith.constant dense<0.000000e+00> : vector<8x160xf32>
    %142 = tpu.matmul %140, %141, %cst_36 {dimension_numbers = #tpu.dot_dimension_numbers<[1], [0], [0], [1], [0, 0, 1, 1], [], []>} : vector<8x32xbf16>, vector<32x160xbf16>, vector<8x160xf32> -> vector<8x160xf32>
    %143 = vector.extract_strided_slice %142 {offsets = [0, 0], sizes = [8, 64], strides = [1, 1]} : vector<8x160xf32> to vector<8x64xf32>
    %144 = arith.mulf %143, %6 : vector<8x64xf32>
    %145 = vector.extract_strided_slice %142 {offsets = [0, 96], sizes = [8, 64], strides = [1, 1]} : vector<8x160xf32> to vector<8x64xf32>
    %146 = arith.mulf %145, %7 : vector<8x64xf32>
    %147 = arith.addf %144, %146 : vector<8x64xf32>
    %148 = vector.extract_strided_slice %142 {offsets = [0, 64], sizes = [8, 32], strides = [1, 1]} : vector<8x160xf32> to vector<8x32xf32>
    %149 = vector.extract_strided_slice %147 {offsets = [0, 0], sizes = [8, 32], strides = [1, 1]} : vector<8x64xf32> to vector<8x32xf32>
    %150 = vector.extract_strided_slice %147 {offsets = [0, 32], sizes = [8, 32], strides = [1, 1]} : vector<8x64xf32> to vector<8x32xf32>
    %151 = vector.extract_strided_slice %127 {offsets = [0, 160], sizes = [32, 32], strides = [1, 1]} : vector<32x320xbf16> to vector<32x32xbf16>
    %152 = tpu.concatenate %149, %149, %149, %149 in 0 : vector<8x32xf32>, vector<8x32xf32>, vector<8x32xf32>, vector<8x32xf32> -> vector<32x32xf32>
    %153 = arith.mulf %152, %10 : vector<32x32xf32>
    %154 = arith.truncf %153 : vector<32x32xf32> to vector<32x32xbf16>
    %155 = tpu.concatenate %150, %150, %150, %150 in 0 : vector<8x32xf32>, vector<8x32xf32>, vector<8x32xf32>, vector<8x32xf32> -> vector<32x32xf32>
    %156 = arith.truncf %155 : vector<32x32xf32> to vector<32x32xbf16>
    %157 = tpu.concatenate %148, %148, %148, %148 in 0 : vector<8x32xf32>, vector<8x32xf32>, vector<8x32xf32>, vector<8x32xf32> -> vector<32x32xf32>
    %158 = arith.mulf %157, %10 : vector<32x32xf32>
    %159 = arith.truncf %158 : vector<32x32xf32> to vector<32x32xbf16>
    %cst_37 = arith.constant dense<0.000000e+00> : vector<32x32xf32>
    %160 = tpu.matmul %154, %156, %cst_37 {dimension_numbers = #tpu.dot_dimension_numbers<[1], [1], [0], [0], [0, 0, 1, 0], [], []>} : vector<32x32xbf16>, vector<32x32xbf16>, vector<32x32xf32> -> vector<32x32xf32>
    %161 = arith.addf %160, %8 : vector<32x32xf32>
    %cst_38 = arith.constant dense<0xFF800000> : vector<32xf32>
    %162 = vector.multi_reduction <maximumf>, %161, %cst_38 [1] : vector<32x32xf32> to vector<32xf32>
    %163 = vector.shape_cast %162 : vector<32xf32> to vector<32x1xf32>
    %164 = vector.broadcast %163 : vector<32x1xf32> to vector<32x32xf32>
    %165 = arith.subf %161, %164 : vector<32x32xf32>
    %166 = math.exp %165 : vector<32x32xf32>
    %cst_39 = arith.constant dense<0.000000e+00> : vector<32xf32>
    %167 = vector.multi_reduction <add>, %166, %cst_39 [1] : vector<32x32xf32> to vector<32xf32>
    %168 = vector.shape_cast %167 : vector<32xf32> to vector<32x1xf32>
    %169 = tpu.reciprocal %168 {approx = true} : vector<32x1xf32> -> vector<32x1xf32>
    %170 = vector.broadcast %169 : vector<32x1xf32> to vector<32x32xf32>
    %171 = arith.mulf %166, %170 : vector<32x32xf32>
    %172 = arith.truncf %171 : vector<32x32xf32> to vector<32x32xbf16>
    %cst_40 = arith.constant dense<0.000000e+00> : vector<32x32xf32>
    %173 = tpu.matmul %172, %159, %cst_40 {dimension_numbers = #tpu.dot_dimension_numbers<[1], [0], [0], [1], [0, 0, 1, 1], [], []>} : vector<32x32xbf16>, vector<32x32xbf16>, vector<32x32xf32> -> vector<32x32xf32>
    %174 = vector.extract_strided_slice %173 {offsets = [0, 0], sizes = [8, 32], strides = [1, 1]} : vector<32x32xf32> to vector<8x32xf32>
    %175 = vector.extract_strided_slice %173 {offsets = [8, 0], sizes = [8, 32], strides = [1, 1]} : vector<32x32xf32> to vector<8x32xf32>
    %176 = arith.addf %174, %175 : vector<8x32xf32>
    %177 = vector.extract_strided_slice %173 {offsets = [16, 0], sizes = [8, 32], strides = [1, 1]} : vector<32x32xf32> to vector<8x32xf32>
    %178 = arith.addf %176, %177 : vector<8x32xf32>
    %179 = vector.extract_strided_slice %173 {offsets = [24, 0], sizes = [8, 32], strides = [1, 1]} : vector<32x32xf32> to vector<8x32xf32>
    %180 = arith.addf %178, %179 : vector<8x32xf32>
    %181 = arith.truncf %180 : vector<8x32xf32> to vector<8x32xbf16>
    %cst_41 = arith.constant dense<0.000000e+00> : vector<8x32xf32>
    %182 = tpu.matmul %181, %151, %cst_41 {dimension_numbers = #tpu.dot_dimension_numbers<[1], [0], [0], [1], [0, 0, 1, 1], [], []>} : vector<8x32xbf16>, vector<32x32xbf16>, vector<8x32xf32> -> vector<8x32xf32>
    %183 = arith.addf %125, %182 : vector<8x32xf32>
    %184 = arith.mulf %183, %183 : vector<8x32xf32>
    %cst_42 = arith.constant dense<0.000000e+00> : vector<8xf32>
    %185 = vector.multi_reduction <add>, %184, %cst_42 [1] : vector<8x32xf32> to vector<8xf32>
    %186 = vector.shape_cast %185 : vector<8xf32> to vector<8x1xf32>
    %cst_43 = arith.constant 3.200000e+01 : f32
    %187 = vector.broadcast %cst_43 : f32 to vector<8x1xf32>
    %188 = arith.divf %186, %187 : vector<8x1xf32>
    %cst_44 = arith.constant 9.99999997E-7 : f32
    %189 = vector.broadcast %cst_44 : f32 to vector<8x1xf32>
    %190 = arith.addf %188, %189 : vector<8x1xf32>
    %191 = math.rsqrt %190 : vector<8x1xf32>
    %192 = vector.broadcast %191 : vector<8x1xf32> to vector<8x32xf32>
    %193 = arith.mulf %183, %192 : vector<8x32xf32>
    %194 = vector.broadcast %20 : vector<1x32xf32> to vector<8x32xf32>
    %195 = arith.mulf %193, %194 : vector<8x32xf32>
    %196 = arith.truncf %195 : vector<8x32xf32> to vector<8x32xbf16>
    %197 = vector.extract_strided_slice %127 {offsets = [0, 192], sizes = [32, 128], strides = [1, 1]} : vector<32x320xbf16> to vector<32x128xbf16>
    %cst_45 = arith.constant dense<0.000000e+00> : vector<8x128xf32>
    %198 = tpu.matmul %196, %197, %cst_45 {dimension_numbers = #tpu.dot_dimension_numbers<[1], [0], [0], [1], [0, 0, 1, 1], [], []>} : vector<8x32xbf16>, vector<32x128xbf16>, vector<8x128xf32> -> vector<8x128xf32>
    %199 = vector.extract_strided_slice %198 {offsets = [0, 0], sizes = [8, 64], strides = [1, 1]} : vector<8x128xf32> to vector<8x64xf32>
    %200 = vector.extract_strided_slice %198 {offsets = [0, 0], sizes = [8, 64], strides = [1, 1]} : vector<8x128xf32> to vector<8x64xf32>
    %201 = arith.negf %200 : vector<8x64xf32>
    %202 = math.exp %201 : vector<8x64xf32>
    %cst_46 = arith.constant 1.000000e+00 : f32
    %203 = vector.broadcast %cst_46 : f32 to vector<8x64xf32>
    %204 = arith.addf %203, %202 : vector<8x64xf32>
    %205 = arith.divf %203, %204 : vector<8x64xf32>
    %206 = arith.mulf %199, %205 : vector<8x64xf32>
    %207 = vector.extract_strided_slice %198 {offsets = [0, 64], sizes = [8, 64], strides = [1, 1]} : vector<8x128xf32> to vector<8x64xf32>
    %208 = arith.mulf %206, %207 : vector<8x64xf32>
    %209 = arith.truncf %208 : vector<8x64xf32> to vector<8x64xbf16>
    %c0_47 = arith.constant 0 : index
    %c0_48 = arith.constant 0 : index
    %c0_49 = arith.constant 0 : index
    %210 = vector.load %arg6[%c0_47, %c0_48, %c0_49] : memref<3x64x32xbf16, #tpu.memory_space<vmem>>, vector<1x64x32xbf16>
    %211 = vector.shape_cast %210 : vector<1x64x32xbf16> to vector<64x32xbf16>
    %cst_50 = arith.constant dense<0.000000e+00> : vector<8x32xf32>
    %212 = tpu.matmul %209, %211, %cst_50 {dimension_numbers = #tpu.dot_dimension_numbers<[1], [0], [0], [1], [0, 0, 1, 1], [], []>} : vector<8x64xbf16>, vector<64x32xbf16>, vector<8x32xf32> -> vector<8x32xf32>
    %213 = arith.addf %183, %212 : vector<8x32xf32>
    %c1 = arith.constant 1 : index
    %c0_51 = arith.constant 0 : index
    %c0_52 = arith.constant 0 : index
    %214 = vector.load %arg5[%c1, %c0_51, %c0_52] : memref<2x32x320xbf16, #tpu.memory_space<vmem>>, vector<1x32x320xbf16>
    %215 = vector.shape_cast %214 : vector<1x32x320xbf16> to vector<32x320xbf16>
    %216 = arith.mulf %213, %213 : vector<8x32xf32>
    %cst_53 = arith.constant dense<0.000000e+00> : vector<8xf32>
    %217 = vector.multi_reduction <add>, %216, %cst_53 [1] : vector<8x32xf32> to vector<8xf32>
    %218 = vector.shape_cast %217 : vector<8xf32> to vector<8x1xf32>
    %cst_54 = arith.constant 3.200000e+01 : f32
    %219 = vector.broadcast %cst_54 : f32 to vector<8x1xf32>
    %220 = arith.divf %218, %219 : vector<8x1xf32>
    %cst_55 = arith.constant 9.99999997E-7 : f32
    %221 = vector.broadcast %cst_55 : f32 to vector<8x1xf32>
    %222 = arith.addf %220, %221 : vector<8x1xf32>
    %223 = math.rsqrt %222 : vector<8x1xf32>
    %224 = vector.broadcast %223 : vector<8x1xf32> to vector<8x32xf32>
    %225 = arith.mulf %213, %224 : vector<8x32xf32>
    %226 = vector.broadcast %19 : vector<1x32xf32> to vector<8x32xf32>
    %227 = arith.mulf %225, %226 : vector<8x32xf32>
    %228 = arith.truncf %227 : vector<8x32xf32> to vector<8x32xbf16>
    %229 = vector.extract_strided_slice %215 {offsets = [0, 0], sizes = [32, 160], strides = [1, 1]} : vector<32x320xbf16> to vector<32x160xbf16>
    %cst_56 = arith.constant dense<0.000000e+00> : vector<8x160xf32>
    %230 = tpu.matmul %228, %229, %cst_56 {dimension_numbers = #tpu.dot_dimension_numbers<[1], [0], [0], [1], [0, 0, 1, 1], [], []>} : vector<8x32xbf16>, vector<32x160xbf16>, vector<8x160xf32> -> vector<8x160xf32>
    %231 = vector.extract_strided_slice %230 {offsets = [0, 0], sizes = [8, 64], strides = [1, 1]} : vector<8x160xf32> to vector<8x64xf32>
    %232 = arith.mulf %231, %6 : vector<8x64xf32>
    %233 = vector.extract_strided_slice %230 {offsets = [0, 96], sizes = [8, 64], strides = [1, 1]} : vector<8x160xf32> to vector<8x64xf32>
    %234 = arith.mulf %233, %7 : vector<8x64xf32>
    %235 = arith.addf %232, %234 : vector<8x64xf32>
    %236 = vector.extract_strided_slice %230 {offsets = [0, 64], sizes = [8, 32], strides = [1, 1]} : vector<8x160xf32> to vector<8x32xf32>
    %237 = vector.extract_strided_slice %235 {offsets = [0, 0], sizes = [8, 32], strides = [1, 1]} : vector<8x64xf32> to vector<8x32xf32>
    %238 = vector.extract_strided_slice %235 {offsets = [0, 32], sizes = [8, 32], strides = [1, 1]} : vector<8x64xf32> to vector<8x32xf32>
    %239 = vector.extract_strided_slice %215 {offsets = [0, 160], sizes = [32, 32], strides = [1, 1]} : vector<32x320xbf16> to vector<32x32xbf16>
    %240 = tpu.concatenate %237, %237, %237, %237 in 0 : vector<8x32xf32>, vector<8x32xf32>, vector<8x32xf32>, vector<8x32xf32> -> vector<32x32xf32>
    %241 = arith.mulf %240, %10 : vector<32x32xf32>
    %242 = arith.truncf %241 : vector<32x32xf32> to vector<32x32xbf16>
    %243 = tpu.concatenate %238, %238, %238, %238 in 0 : vector<8x32xf32>, vector<8x32xf32>, vector<8x32xf32>, vector<8x32xf32> -> vector<32x32xf32>
    %244 = arith.truncf %243 : vector<32x32xf32> to vector<32x32xbf16>
    %245 = tpu.concatenate %236, %236, %236, %236 in 0 : vector<8x32xf32>, vector<8x32xf32>, vector<8x32xf32>, vector<8x32xf32> -> vector<32x32xf32>
    %246 = arith.mulf %245, %10 : vector<32x32xf32>
    %247 = arith.truncf %246 : vector<32x32xf32> to vector<32x32xbf16>
    %cst_57 = arith.constant dense<0.000000e+00> : vector<32x32xf32>
    %248 = tpu.matmul %242, %244, %cst_57 {dimension_numbers = #tpu.dot_dimension_numbers<[1], [1], [0], [0], [0, 0, 1, 0], [], []>} : vector<32x32xbf16>, vector<32x32xbf16>, vector<32x32xf32> -> vector<32x32xf32>
    %249 = arith.addf %248, %8 : vector<32x32xf32>
    %cst_58 = arith.constant dense<0xFF800000> : vector<32xf32>
    %250 = vector.multi_reduction <maximumf>, %249, %cst_58 [1] : vector<32x32xf32> to vector<32xf32>
    %251 = vector.shape_cast %250 : vector<32xf32> to vector<32x1xf32>
    %252 = vector.broadcast %251 : vector<32x1xf32> to vector<32x32xf32>
    %253 = arith.subf %249, %252 : vector<32x32xf32>
    %254 = math.exp %253 : vector<32x32xf32>
    %cst_59 = arith.constant dense<0.000000e+00> : vector<32xf32>
    %255 = vector.multi_reduction <add>, %254, %cst_59 [1] : vector<32x32xf32> to vector<32xf32>
    %256 = vector.shape_cast %255 : vector<32xf32> to vector<32x1xf32>
    %257 = tpu.reciprocal %256 {approx = true} : vector<32x1xf32> -> vector<32x1xf32>
    %258 = vector.broadcast %257 : vector<32x1xf32> to vector<32x32xf32>
    %259 = arith.mulf %254, %258 : vector<32x32xf32>
    %260 = arith.truncf %259 : vector<32x32xf32> to vector<32x32xbf16>
    %cst_60 = arith.constant dense<0.000000e+00> : vector<32x32xf32>
    %261 = tpu.matmul %260, %247, %cst_60 {dimension_numbers = #tpu.dot_dimension_numbers<[1], [0], [0], [1], [0, 0, 1, 1], [], []>} : vector<32x32xbf16>, vector<32x32xbf16>, vector<32x32xf32> -> vector<32x32xf32>
    %262 = vector.extract_strided_slice %261 {offsets = [0, 0], sizes = [8, 32], strides = [1, 1]} : vector<32x32xf32> to vector<8x32xf32>
    %263 = vector.extract_strided_slice %261 {offsets = [8, 0], sizes = [8, 32], strides = [1, 1]} : vector<32x32xf32> to vector<8x32xf32>
    %264 = arith.addf %262, %263 : vector<8x32xf32>
    %265 = vector.extract_strided_slice %261 {offsets = [16, 0], sizes = [8, 32], strides = [1, 1]} : vector<32x32xf32> to vector<8x32xf32>
    %266 = arith.addf %264, %265 : vector<8x32xf32>
    %267 = vector.extract_strided_slice %261 {offsets = [24, 0], sizes = [8, 32], strides = [1, 1]} : vector<32x32xf32> to vector<8x32xf32>
    %268 = arith.addf %266, %267 : vector<8x32xf32>
    %269 = arith.truncf %268 : vector<8x32xf32> to vector<8x32xbf16>
    %cst_61 = arith.constant dense<0.000000e+00> : vector<8x32xf32>
    %270 = tpu.matmul %269, %239, %cst_61 {dimension_numbers = #tpu.dot_dimension_numbers<[1], [0], [0], [1], [0, 0, 1, 1], [], []>} : vector<8x32xbf16>, vector<32x32xbf16>, vector<8x32xf32> -> vector<8x32xf32>
    %271 = arith.addf %213, %270 : vector<8x32xf32>
    %272 = arith.mulf %271, %271 : vector<8x32xf32>
    %cst_62 = arith.constant dense<0.000000e+00> : vector<8xf32>
    %273 = vector.multi_reduction <add>, %272, %cst_62 [1] : vector<8x32xf32> to vector<8xf32>
    %274 = vector.shape_cast %273 : vector<8xf32> to vector<8x1xf32>
    %cst_63 = arith.constant 3.200000e+01 : f32
    %275 = vector.broadcast %cst_63 : f32 to vector<8x1xf32>
    %276 = arith.divf %274, %275 : vector<8x1xf32>
    %cst_64 = arith.constant 9.99999997E-7 : f32
    %277 = vector.broadcast %cst_64 : f32 to vector<8x1xf32>
    %278 = arith.addf %276, %277 : vector<8x1xf32>
    %279 = math.rsqrt %278 : vector<8x1xf32>
    %280 = vector.broadcast %279 : vector<8x1xf32> to vector<8x32xf32>
    %281 = arith.mulf %271, %280 : vector<8x32xf32>
    %282 = vector.broadcast %21 : vector<1x32xf32> to vector<8x32xf32>
    %283 = arith.mulf %281, %282 : vector<8x32xf32>
    %284 = arith.truncf %283 : vector<8x32xf32> to vector<8x32xbf16>
    %285 = vector.extract_strided_slice %215 {offsets = [0, 192], sizes = [32, 128], strides = [1, 1]} : vector<32x320xbf16> to vector<32x128xbf16>
    %cst_65 = arith.constant dense<0.000000e+00> : vector<8x128xf32>
    %286 = tpu.matmul %284, %285, %cst_65 {dimension_numbers = #tpu.dot_dimension_numbers<[1], [0], [0], [1], [0, 0, 1, 1], [], []>} : vector<8x32xbf16>, vector<32x128xbf16>, vector<8x128xf32> -> vector<8x128xf32>
    %287 = vector.extract_strided_slice %286 {offsets = [0, 0], sizes = [8, 64], strides = [1, 1]} : vector<8x128xf32> to vector<8x64xf32>
    %288 = vector.extract_strided_slice %286 {offsets = [0, 0], sizes = [8, 64], strides = [1, 1]} : vector<8x128xf32> to vector<8x64xf32>
    %289 = arith.negf %288 : vector<8x64xf32>
    %290 = math.exp %289 : vector<8x64xf32>
    %cst_66 = arith.constant 1.000000e+00 : f32
    %291 = vector.broadcast %cst_66 : f32 to vector<8x64xf32>
    %292 = arith.addf %291, %290 : vector<8x64xf32>
    %293 = arith.divf %291, %292 : vector<8x64xf32>
    %294 = arith.mulf %287, %293 : vector<8x64xf32>
    %295 = vector.extract_strided_slice %286 {offsets = [0, 64], sizes = [8, 64], strides = [1, 1]} : vector<8x128xf32> to vector<8x64xf32>
    %296 = arith.mulf %294, %295 : vector<8x64xf32>
    %297 = arith.truncf %296 : vector<8x64xf32> to vector<8x64xbf16>
    %c1_67 = arith.constant 1 : index
    %c0_68 = arith.constant 0 : index
    %c0_69 = arith.constant 0 : index
    %298 = vector.load %arg6[%c1_67, %c0_68, %c0_69] : memref<3x64x32xbf16, #tpu.memory_space<vmem>>, vector<1x64x32xbf16>
    %299 = vector.shape_cast %298 : vector<1x64x32xbf16> to vector<64x32xbf16>
    %cst_70 = arith.constant dense<0.000000e+00> : vector<8x32xf32>
    %300 = tpu.matmul %297, %299, %cst_70 {dimension_numbers = #tpu.dot_dimension_numbers<[1], [0], [0], [1], [0, 0, 1, 1], [], []>} : vector<8x64xbf16>, vector<64x32xbf16>, vector<8x32xf32> -> vector<8x32xf32>
    %301 = arith.addf %271, %300 : vector<8x32xf32>
    %302 = arith.mulf %301, %301 : vector<8x32xf32>
    %cst_71 = arith.constant dense<0.000000e+00> : vector<8xf32>
    %303 = vector.multi_reduction <add>, %302, %cst_71 [1] : vector<8x32xf32> to vector<8xf32>
    %304 = vector.shape_cast %303 : vector<8xf32> to vector<8x1xf32>
    %cst_72 = arith.constant 3.200000e+01 : f32
    %305 = vector.broadcast %cst_72 : f32 to vector<8x1xf32>
    %306 = arith.divf %304, %305 : vector<8x1xf32>
    %cst_73 = arith.constant 9.99999997E-7 : f32
    %307 = vector.broadcast %cst_73 : f32 to vector<8x1xf32>
    %308 = arith.addf %306, %307 : vector<8x1xf32>
    %309 = math.rsqrt %308 : vector<8x1xf32>
    %310 = vector.broadcast %309 : vector<8x1xf32> to vector<8x32xf32>
    %311 = arith.mulf %301, %310 : vector<8x32xf32>
    %312 = vector.broadcast %17 : vector<1x32xf32> to vector<8x32xf32>
    %313 = arith.mulf %311, %312 : vector<8x32xf32>
    %314 = arith.truncf %313 : vector<8x32xf32> to vector<8x32xbf16>
    %cst_74 = arith.constant dense<0.000000e+00> : vector<8x128xf32>
    %315 = tpu.matmul %314, %23, %cst_74 {dimension_numbers = #tpu.dot_dimension_numbers<[1], [0], [0], [1], [0, 0, 1, 1], [], []>} : vector<8x32xbf16>, vector<32x128xbf16>, vector<8x128xf32> -> vector<8x128xf32>
    %316 = vector.shape_cast %315 : vector<8x128xf32> to vector<1x8x128xf32>
    %c0_75 = arith.constant 0 : index
    %c0_76 = arith.constant 0 : index
    %c0_77 = arith.constant 0 : index
    %317 = vector.load %arg7[%c0_75, %c0_76, %c0_77] : memref<1x8x128xf32, #tpu.memory_space<vmem>>, vector<1x8x128xf32>
    tpu.vector_store %arg7[%c0_75, %c0_76, %c0_77], %316 {strides = array<i32>} : memref<1x8x128xf32, #tpu.memory_space<vmem>>, vector<1x8x128xf32>,
    return
  }
  func.func @transform_0(%arg0: i32) -> (i32, i32, i32) {
    %c0_i32 = arith.constant 0 : i32
    %c0_i32_0 = arith.constant 0 : i32
    %c0_i32_1 = arith.constant 0 : i32
    return %arg0, %c0_i32, %c0_i32_0 : i32, i32, i32
  }
  func.func @transform_1(%arg0: i32) -> (i32, i32, i32) {
    %c0_i32 = arith.constant 0 : i32
    %c0_i32_0 = arith.constant 0 : i32
    %c0_i32_1 = arith.constant 0 : i32
    return %arg0, %c0_i32, %c0_i32_0 : i32, i32, i32
  }
  func.func @transform_2(%arg0: i32) -> (i32, i32) {
    %c0_i32 = arith.constant 0 : i32
    %c0_i32_0 = arith.constant 0 : i32
    %c0_i32_1 = arith.constant 0 : i32
    return %c0_i32, %c0_i32_0 : i32, i32
  }
  func.func @transform_3(%arg0: i32) -> (i32, i32) {
    %c0_i32 = arith.constant 0 : i32
    %c0_i32_0 = arith.constant 0 : i32
    %c0_i32_1 = arith.constant 0 : i32
    return %c0_i32, %c0_i32_0 : i32, i32
  }
  func.func @transform_4(%arg0: i32) -> (i32, i32, i32) {
    %c0_i32 = arith.constant 0 : i32
    %c0_i32_0 = arith.constant 0 : i32
    %c0_i32_1 = arith.constant 0 : i32
    %c0_i32_2 = arith.constant 0 : i32
    return %c0_i32, %c0_i32_0, %c0_i32_1 : i32, i32, i32
  }
  func.func @transform_5(%arg0: i32) -> (i32, i32, i32) {
    %c0_i32 = arith.constant 0 : i32
    %c0_i32_0 = arith.constant 0 : i32
    %c0_i32_1 = arith.constant 0 : i32
    %c0_i32_2 = arith.constant 0 : i32
    return %c0_i32, %c0_i32_0, %c0_i32_1 : i32, i32, i32
  }
  func.func @transform_6(%arg0: i32) -> (i32, i32, i32) {
    %c0_i32 = arith.constant 0 : i32
    %c0_i32_0 = arith.constant 0 : i32
    %c0_i32_1 = arith.constant 0 : i32
    return %arg0, %c0_i32, %c0_i32_0 : i32, i32, i32
  }
}

</mosaic_0001>

<bundles_post_ra>
// kernel: tpu_custom_call.1
= control target key start
LH: loop header
LB: loop body
LE: loop exit
PB: predicated region body
PF: predicated region fallthrough
CT: control target
= control target key end

     0   :  { %s2845_s0 = inlined_call_operand.hbm [shape: bf16[2,8,32], index: 0, kind: input, shape index: {}]   ;;  %s2846_s1 = inlined_call_operand.hbm [shape: bf16[2,4,32], index: 1, kind: input, shape index: {}]   ;;  %s2847_s2 = inlined_call_operand.hbm [shape: f32[72,128], index: 2, kind: input, shape index: {}]   ;;  %s2848_s3 = inlined_call_operand.vmem [shape: bf16[32,320], index: 3, kind: input, shape index: {}]   ;;  %s2849_s4 = inlined_call_operand.vmem [shape: bf16[2,32,320], index: 4, kind: input, shape index: {}]   ;;  %s2850_s5 = inlined_call_operand.vmem [shape: bf16[3,64,32], index: 5, kind: input, shape index: {}]   ;;  %s2851_s6 = inlined_call_operand.hbm [shape: f32[2,8,128], index: 6, kind: output, shape index: {}]  }
   0x1   :  { %2856 = sst [smem:[#allocation17_spill]] %s2847_s2 }
   0x2   :  { %11 = vsyncpa [#allocation3], 0 }
   0x3   :  { %13 = vsyncpa [#allocation3 + $0x1], 0 }
   0x4   :  { %14 = vsyncpa [#allocation6], 0 }
   0x5   :  { %16 = vsyncpa [#allocation6 + $0x1], 0 }
   0x6   :  { %17 = vsyncpa [#allocation4], 0 }
   0x7   :  { %19 = vsyncpa [#allocation4 + $0x1], 0  ;;  %s2246_s21 = smov 0   ;;  %s2248_s22 = smov 0  }
   0x8   :  { %s2250_s23 = smov 0   ;;  %s2252_s24 = smov 0  }
   0x9 LB: > { %2857 = sst [smem:[#allocation13_spill]] %s2196_s23  ;;  %s2270_s28 = sadd.s32 4294967295, %s2200_s24   ;;  %s2200_s24 = sphi %s2252_s24, %s2870_s24   ;;  %s2196_s23 = sphi %s2250_s23, %s2872_s23   ;;  %s2192_s22 = sphi %s2248_s22, %s2874_s22   ;;  %s2188_s21 = sphi %s2246_s21, %s2873_s21  }
   0xa   : > { %s2858_s2 = sld [smem:[#allocation17_spill]]  ;;  %p1664_p0 = scmp.ge.s32.totalorder %s2200_s24, 1 }
   0xb   : > { %p46_p1 = scmp.eq.s32.totalorder %s2270_s28, 0  ;;  %p192_p2 = scmp.lt.s32.totalorder %s2200_s24, 3 }
   0xc   : > { %s2202_s30 = smov [#allocation7]   ;;  %s2203_s8 = smov 128  }
   0xd   : > { %p2275_p3 = pnand %p1664_p0, %p192_p2  ;;  %s205_s7 = sshll.u32 %s2202_s30, 4  ;;  %s206_s7 = int_to_ptr.vmem [resolvable:$true] %s205_s7 }
   0xe   : > { %s2204_s9 = smov 8   ;;  %s1663_s10 = sadd.s32 4294967294, %s2200_s24  }
   0xf   : > { %p1895_p4 = pneg %p2275_p3  ;;  %s2286_s11 = sadd.s32 1, %s2200_s24  }
  0x10   : > { %s203_s27 = sshll.u32 %s2858_s2, 4  ;;  %2860 = sst [smem:[#allocation14_spill]] %s2286_s11  ;;  %s204_s27 = int_to_ptr.hbm [resolvable:$true] %s203_s27 }
  0x11   : > { %p1896_p6 = pnand %p1895_p4, %p46_p1  ;;  %s32_s12 = sadd.s32 1, %s2196_s23 }
  0x12   : > { %s29_s13 = ssub.s32 %s2200_s24, %s2286_s11  ;;  %p39_p7 = scmp.ne.s32.totalorder %s2196_s23, %s2192_s22 }
  0x13   : > { %1898 = dma.hbm_to_vmem [thread:$0]  (!%p1896_p6), %s204_s27, 1152, %s206_s7, [#allocation6], %s2203_s8, %s2203_s8, %s2204_s9  }
  0x14   : > { %p30_p8 = scmp.eq.s32.totalorder %s29_s13, 0  ;;  %p40_p9 = scmp.eq.s32.totalorder %s2200_s24, 0 }
  0x15   : > { %p45_p10 = scmp.ne.s32.totalorder %s2192_s22, %s2188_s21  ;;  %p179_p11 = scmp.eq.s32.totalorder %s2270_s28, 1 }
  0x16   : > { %s2298_s14 = scalar_select %p30_p8, %s2196_s23, %s32_s12  }
  0x17   : > { %p2300_p12 = por %p40_p9, %p39_p7  ;;  %p2306_p13 = por %p46_p1, %p45_p10 }
  0x18   : > { %2861 = sst [smem:[#allocation15_spill]] %s2298_s14  ;;  %p2310_p0 = por %p179_p11, %p39_p7 }
  0x19   : > { %p185_p2 = scmp.eq.s32.totalorder %s1663_s10, 1  ;;  %p1911_p4 = scmp.lt.s32.totalorder %s2200_s24, 2 }
  0x1a   : > { %s2316_s18 = sand.u32 1, %s2196_s23   ;;  %s1668_s25 = sshll.u32 %s2200_s24, 2 }
  0x1b   : > { %p2318_p6 = por %p185_p2, %p45_p10  ;;  %s1667_s20 = sshll.u32 %s2316_s18, 2 }
  0x1c   : > { %s236_s30 = scalar_lea.hbm %s2845_s0, %s1668_s25  ;;  %s232_s8 = scalar_lea.vmem [#allocation2], %s1667_s20 }
  0x1d   : > { %s2865_s19 = scalar_select %p2318_p6, 1, 0 }
  0x1e   : > { %s238_s7 = sshll.u32 %s236_s30, 4  ;;  %s240_s9 = sshll.u32 %s232_s8, 4  ;;  %s239_s7 = int_to_ptr.hbm [resolvable:$true] %s238_s7  ;;  %s241_s9 = int_to_ptr.vmem [resolvable:$true] %s240_s9 }
  0x1f   : > { %2866 = sst [smem:[#allocation16_spill]] %s2865_s19  ;;  %p2329_p7 = pnand %p1911_p4, %p2300_p12 }
  0x20   : > { %s247_s12 = sand.u32 1, %s2200_s24   ;;  %s1669_s13 = sshll.u32 %s2316_s18, 1 }
  0x21   : > { %s229_s2 = scalar_lea.sflag [#allocation3], %s2316_s18  ;;  %s2066_s14 = sshra.s32 %s239_s7, 4  ;;  %s2067_s14 = int_to_ptr.hbm [resolvable:$true] %s2066_s14 }
  0x22   : > { %s2068_s23 = scalar_lea.hbm %s2067_s14, 4  ;;  %p2070_p9 = pneg %p2329_p7 }
  0x23   : > { %p2069_p8 = scmp.ne.s32.totalorder %s2067_s14, %s2068_s23  ;;  %s2073_s25 = scalar_lea.hbm %s2845_s0, 8 }
  0x24   : > { %p2074_p12 = scmp.lt.s32.totalorder %s2067_s14, %s2845_s0  ;;  %p2075_p2 = scmp.lt.s32.totalorder %s2073_s25, %s2068_s23 }
  0x25   : > { %p2071_p10 = pnand %p2070_p9, %p2069_p8 }
  0x26   : > { %p2076_p4 = por %p2075_p2, %p2074_p12 }
  0x27   : > { %p2072_p11 = pneg %p2071_p10 }
  0x29   : > { %p2077_p5 = pnand %p2076_p4, %p2072_p11 }
  0x2b   : > { %2080 = shalt.err (!%p2077_p5)
}
  0x2c   : > { %1902 = dma.hbm_to_vmem [thread:$0]  (!%p2329_p7), %s239_s7, 64, %s241_s9, %s229_s2  }
  0x2d   : > { %s1670_s18 = sshll.u32 %s2200_s24, 1  ;;  %s251_s30 = scalar_lea.vmem [#allocation5], %s1669_s13 }
  0x2e   : > { %s259_s8 = sshll.u32 %s251_s30, 4  ;;  %s255_s15 = scalar_lea.hbm %s2846_s1, %s1670_s18  ;;  %s260_s8 = int_to_ptr.vmem [resolvable:$true] %s259_s8 }
  0x2f   : > { %s257_s20 = sshll.u32 %s255_s15, 4  ;;  %s248_s14 = scalar_lea.sflag [#allocation6], %s247_s12  ;;  %s258_s20 = int_to_ptr.hbm [resolvable:$true] %s257_s20 }
  0x30   : > { %s2096_s23 = sshra.s32 %s258_s20, 4  ;;  %s2103_s9 = scalar_lea.hbm %s2846_s1, 4  ;;  %s2097_s23 = int_to_ptr.hbm [resolvable:$true] %s2096_s23 }
  0x31   : > { %s2098_s25 = scalar_lea.hbm %s2097_s23, 2  ;;  %p2104_p11 = scmp.lt.s32.totalorder %s2097_s23, %s2846_s1 }
  0x32   : > { %p2099_p5 = scmp.ne.s32.totalorder %s2097_s23, %s2098_s25  ;;  %p2105_p12 = scmp.lt.s32.totalorder %s2103_s9, %s2098_s25 }
  0x34   : > { %p2101_p8 = pnand %p2099_p5, %p2070_p9  ;;  %p2106_p2 = por %p2105_p12, %p2104_p11 }
  0x36   : > { %p2102_p10 = pneg %p2101_p8 }
  0x38   : > { %p2107_p4 = pnand %p2106_p2, %p2102_p10 }
  0x3a   : > { %2110 = shalt.err (!%p2107_p4)
}
  0x3b   : > { %1905 = dma.hbm_to_vmem [thread:$0]  (!%p2329_p7), %s258_s20, 32, %s260_s8, %s248_s14  }
  0x3c   : > { %268 = sbr.rel (%p2275_p3) target bundleno = 5480 (0x1568), region = 44  ;;  %s2367_s11 = sand.u32 (!%p2275_p3), 1, %s2192_s22  }
  0x3d   : > { %s1672_s19 = sshll.u32 (!%p2275_p3), %s2367_s11, 2  ;;  %s271_s12 = scalar_lea.sflag (!%p2275_p3), [#allocation3], %s2367_s11 }
  0x3e   : > { %s274_s27 = scalar_lea.vmem (!%p2275_p3), [#allocation2], %s1672_s19 }
  0x41   : > { %2171 = dma.done.wait (%p2306_p13), %s271_s12, 64  }
  0x42   : > { %2173 = vsyncadd (%p2306_p13), %s271_s12, 4294967232  ;;  %s280_s10 = sand.u32 1, %s2270_s28   ;;  %s1673_s29 = sshll.u32 %s2367_s11, 1 }
  0x43   : > { %s281_s18 = scalar_lea.sflag [#allocation6], %s280_s10  ;;  %s2377_s30 = scalar_lea.vmem [#allocation5], %s1673_s29 }
  0x44   : > { %2175 = dma.done.wait (%p2306_p13), %s281_s18, 32  }
  0x45   : > { %2177 = vsyncadd (%p2306_p13), %s281_s18, 4294967264 }
  0x46   : > { %2179 = dma.done.wait (%p46_p1), [#allocation6], 1152  }
  0x47   : > { %2181 = vsyncadd (%p46_p1), [#allocation6], 4294966144  ;;  %v325_v0 = vld [vmem:[%s274_s27] sm:$0xf]  ;;  %vm354_vm0 = vcmask 261120   ;;  %v2205_v3 = vmov 32.0  }
  0x48   : > { %v2387_v1 = vunpack.c.l.bf16 %v325_v0  ;;  %1955 = vrcp.f32 %v2205_v3  ;;  %v1858_v4 = vld [vmem:[%s2848_s3 + $0x1c] sm:$0xf]  ;;  %v1688_v5 = vld [vmem:[%s2848_s3 + $0x24] sm:$0xf0]  ;;  %v1855_v7 = vld [vmem:[%s2848_s3 + $0x4] sm:$0xf] }
  0x49   : > { %v2397_v6 = vor.u32 %v1858_v4, %v1688_v5  ;;  %v1684_v8 = vld [vmem:[%s2848_s3 + $0xc] sm:$0xf0]  ;;  %s2206_s7 = smov 96   ;;  %v327_v23 = vld [vmem:[%s2377_s30] sm:$0x3]  ;;  %v2424_v26 = vld [vmem:[#allocation7 + $0x8] sm:$0xff] }
  0x4a   : > { %v355_v2 = vsel %vm354_vm0, %v2387_v1, 0.0  ;;  %v2408_v10 = vor.u32 %v1855_v7, %v1684_v8  ;;  %v2420_v24 = vld [vmem:[#allocation7 + $0x20] sm:$0xff]  ;;  %v2422_v25 = vld [vmem:[#allocation7 + $0x18] sm:$0xff]  ;;  %s2207_s9 = smov 80   ;;  %v2430_v30 = vld [vmem:[#allocation7 + $0x10] sm:$0xff]  ;;  %vm464_vm5 = vcmask 1043456  }
  0x4b   : > { %356 = vadd.xlane.f32.xlu0 %v355_v2  ;;  %419 = vrot.lane.b32.xlu1 %v2397_v6, %s2206_s7  ;;  %v2439_v36 = vld [vmem:[#allocation7 + $0x38] sm:$0xff]  ;;  %vm518_vm6 = vcmask 130048   ;;  %s2208_s13 = smov 32   ;;  %vm720_vm14 = vcmask 523264   ;;  %s2209_s2 = smov 16  }
  0x4c   : > { %410 = vmatpush.bf16.msra.mxu0 %v2397_v6  ;;  %443 = vrot.lane.b32.xlu2 %v2424_v26, %s2207_s9  ;;  %v384_v38 = vperm.slane %v2439_v36, 0  ;;  %v386_v41 = vperm.slane %v2439_v36, 1  ;;  %s1852_s27 = sshll.u32 %s2270_s28, 3  ;;  %s1675_s10 = sshll.u32 %s2367_s11, 3 }
  0x4d   : > { %s1556_s30 = scalar_lea.hbm %s2851_s6, %s1852_s27  ;;  %s323_s8 = scalar_lea.vmem [#allocation8], %s1675_s10 }
  0x4e   : > { %v1956_v9 = vpop.eup %1955  ;;  %s1558_s15 = sshll.u32 %s323_s8, 4  ;;  %s1560_s16 = sshll.u32 %s1556_s30, 4  ;;  %s1559_s15 = int_to_ptr.vmem [resolvable:$true] %s1558_s15  ;;  %s1561_s16 = int_to_ptr.hbm [resolvable:$true] %s1560_s16 }
  0x4f   : > { %v359_v11 = vmul.f32 32.0, %v1956_v9  ;;  %vm363_vm1 = vweird.f32 %v1956_v9  ;;  %s1546_s20 = scalar_lea.sflag [#allocation4], %s2367_s11  ;;  %s2140_s14 = sshra.s32 %s1561_s16, 4  ;;  %s2141_s14 = int_to_ptr.hbm [resolvable:$true] %s2140_s14 }
  0x50   : > { %411 = vmatpush.bf16.msra.mxu0 %v2408_v10  ;;  %s2142_s23 = scalar_lea.hbm %s2141_s14, 8  ;;  %s2146_s25 = scalar_lea.hbm %s2851_s6, 16 }
  0x51   : > { %v360_v12 = vsub.f32 1.0, %v359_v11  ;;  %p2143_p1 = scmp.ne.s32.totalorder %s2141_s14, %s2142_s23  ;;  %p2147_p7 = scmp.lt.s32.totalorder %s2141_s14, %s2851_s6 }
  0x52   : > { %p2148_p9 = scmp.lt.s32.totalorder %s2146_s25, %s2142_s23 }
  0x53   : > { %417 = vrot.lane.b32.xlu1 %v2408_v10, %s2206_s7  ;;  %v361_v13 = vmul.f32 %v1956_v9, %v360_v12  ;;  %p2144_p3 = pnand %p2143_p1, %p2310_p0 }
  0x54   : > { %445 = vrot.lane.b32.xlu2 %v2430_v30, %s2207_s9  ;;  %p2149_p5 = por %p2148_p9, %p2147_p7 }
  0x55   : > { %v362_v14 = vadd.f32 %v1956_v9, %v361_v13  ;;  %p2145_p13 = pneg %p2144_p3 }
  0x57   : > { %v2413_v15 = vsel %vm363_vm1, %v1956_v9, %v362_v14  ;;  %p2150_p8 = pnand %p2149_p5, %p2145_p13 }
  0x5b   : > { %449 = vrot.lane.b32.xlu1 %v2420_v24, %s2207_s9 }
  0x5c   : > { %478 = vrot.lane.b32.xlu2 %v2424_v26, %s2206_s7 }
  0x63   : > { %480 = vrot.lane.b32.xlu1 %v2430_v30, %s2206_s7 }
  0x64   : > { %482 = vrot.lane.b32.xlu2 %v2422_v25, %s2206_s7 }
  0x6b   : > { %484 = vrot.lane.b32.xlu1 %v2420_v24, %s2206_s7 }
  0xa6   : > { %v2451_v51 = vpop.permute.xlu2 %443 }
  0xae   : > { %v2453_v52 = vpop.permute.xlu2 %445 }
  0xb6   : > { %v479_v63 = vpop.permute.xlu2 %478 }
  0xbd   : > { %v420_v21 = vpop.permute.xlu1 %419 }
  0xbe   : > { %v357_v16 = vpop.xlane.xlu0 %356  ;;  %432 = vmatpush.bf16.msra.mxu1 %v420_v21  ;;  %v483_v9 = vpop.permute.xlu2 %482 }
  0xbf   : > { %v365_v17 = vmul.f32 %v2413_v15, %v357_v16 }
  0xc1   : > { %v366_v18 = vsub.f32 %v2387_v1, %v365_v17 }
  0xc3   : > { %v367_v19 = vmul.f32 %v366_v18, %v366_v18 }
  0xc5   : > { %v368_v20 = vsel %vm354_vm0, %v367_v19, 0.0  ;;  %v418_v22 = vpop.permute.xlu1 %417  ;;  %v333_v19 = vld [vmem:[#allocation7 + $0x28] sm:$0xff] }
  0xc6   : > { %369 = vadd.xlane.f32.xlu0 %v368_v20  ;;  %433 = vmatpush.bf16.msra.mxu1 %v418_v22  ;;  %v334_v20 = vld [vmem:[#allocation7 + $0x30] sm:$0xff] }
  0xc9   : > { %1693 = vmatmul.msk.bf16.vlgmr.msra.gmra.mxu1 %vm354_vm0, %v327_v23 }
  0xcd   : > { %v2458_v58 = vpop.permute.xlu1 %449 }
  0xd5   : > { %v481_v4 = vpop.permute.xlu1 %480 }
  0xda   : > { %447 = vrot.lane.b32.xlu0 %v2422_v25, %s2207_s9  ;;  %s2210_s9 = smov 64  }
  0xdd   : > { %v485_v14 = vpop.permute.xlu1 %484 }
 0x139   : > { %v370_v27 = vpop.xlane.xlu0 %369 }
 0x13a   : > { %v371_v28 = vmul.f32 %v370_v27, %v2413_v15 }
 0x13c   : > { %v372_v29 = vadd.f32 1e-05, %v371_v28 }
 0x13e   : > { %1957 = vrsqrt.f32 %v372_v29  ;;  %vm379_vm3 = vweird.f32 %v372_v29 }
 0x144   : > { %v1958_v31 = vpop.eup %1957 }
 0x145   : > { %v374_v32 = vmul.f32 %v1958_v31, %v372_v29  ;;  %vm380_vm2 = vweird.f32 %v1958_v31 }
 0x146   : > { %vm381_vm4 = vmor %vm379_vm3, %vm380_vm2  ;;  %v435_v45 = vpop.f32.mrf.mxu1 }
 0x147   : > { %v375_v33 = vmul.f32 %v1958_v31, %v374_v32  ;;  %v462_v46 = vrot.slane %v435_v45, 4 }
 0x149   : > { %v376_v34 = vmul.f32 0.5, %v375_v33  ;;  %v2446_v47 = vsel %vm464_vm5, %v435_v45, %v462_v46 }
 0x14a   : > { %v466_v48 = vpack.c.bf16 %v2446_v47, %v2446_v47 }
 0x14b   : > { %v377_v35 = vsub.f32 1.5, %v376_v34 }
 0x14c   : > { %v497_v49 = vsel %vm354_vm0, %v466_v48, 0  ;;  %v2460_v59 = vpop.permute.xlu0 %447 }
 0x14d   : > { %v378_v37 = vmul.f32 %v1958_v31, %v377_v35  ;;  %506 = vmatpush.bf16.xpose.msra.mxu2 %v497_v49 }
 0x14e   : > { %v437_v50 = vpop.f32.mrf.mxu1 }
 0x14f   : > { %v382_v39 = vsel %vm381_vm4, %v1958_v31, %v378_v37 }
 0x150   : > { %v383_v40 = vmul.f32 %v382_v39, %v366_v18 }
 0x152   : > { %v385_v42 = vmul.f32 %v384_v38, %v383_v40 }
 0x154   : > { %v387_v43 = vadd.f32 %v386_v41, %v385_v42 }
 0x156   : > { %v388_v44 = vpack.c.bf16 %v387_v43, %v387_v43 }
 0x158   : > { %1692 = vmatmul.msk.bf16.vlgmr.msra.gmra.mxu0 %vm354_vm0, %v388_v44 }
 0x1d5   : > { %v413_v53 = vpop.f32.mrf.mxu0 }
 0x1d6   : > { %v455_v54 = vmul.f32 %v2451_v51, %v413_v53  ;;  %v456_v55 = vmul.f32 %v2453_v52, %v413_v53  ;;  %v458_v60 = vmul.f32 %v2458_v58, %v413_v53  ;;  %v457_v61 = vmul.f32 %v2460_v59, %v413_v53 }
 0x1d8   : > { %v459_v56 = vpack.c.bf16 %v456_v55, %v455_v54  ;;  %v460_v62 = vpack.c.bf16 %v458_v60, %v457_v61 }
 0x1da   : > { %1694 = vmatmul.msk.bf16.vlgmr.msra.gmra.mxu2 %vm354_vm0, %v459_v56 }
 0x1dd   : > { %v415_v57 = vpop.f32.mrf.mxu0 }
 0x1ea   : > { %1695 = vmatmul.msk.bf16.gmra.mxu2 %vm354_vm0, %v460_v62 }
 0x25d   : > { %v508_v0 = vpop.f32.mrf.mxu2 }
 0x25e   : > { %v509_v2 = vadd.f32 %v508_v0, %v479_v63 }
 0x260   : > { %v519_v3 = vsel %vm518_vm6, %v509_v2, -inf }
 0x261   : > { %520 = vmax.xlane.f32.xlu2 %v519_v3 }
 0x265   : > { %v510_v5 = vpop.f32.mrf.mxu2 }
 0x266   : > { %v511_v7 = vadd.f32 %v510_v5, %v481_v4 }
 0x268   : > { %v522_v8 = vsel %vm518_vm6, %v511_v7, -inf }
 0x269   : > { %523 = vmax.xlane.f32.xlu0 %v522_v8 }
 0x26d   : > { %v513_v11 = vpop.f32.mrf.mxu2 }
 0x26e   : > { %v514_v12 = vadd.f32 %v513_v11, %v483_v9 }
 0x270   : > { %v525_v13 = vsel %vm518_vm6, %v514_v12, -inf }
 0x271   : > { %526 = vmax.xlane.f32.xlu1 %v525_v13 }
 0x275   : > { %v515_v16 = vpop.f32.mrf.mxu2 }
 0x276   : > { %v516_v17 = vadd.f32 %v515_v16, %v485_v14 }
 0x278   : > { %v528_v18 = vsel %vm518_vm6, %v516_v17, -inf }
 0x279   : > { %529 = vmax.xlane.f32.xlu2 %v528_v18 }
 0x27d   : > { %469 = vrot.lane.b32.xlu0 %v333_v19, %s2208_s13 }
 0x291   : > { %471 = vrot.lane.b32.xlu2 %v334_v20, %s2208_s13 }
 0x2d4   : > { %v521_v21 = vpop.xlane.xlu2 %520 }
 0x2d5   : > { %v531_v22 = vsub.f32 %v509_v2, %v521_v21 }
 0x2d7   : > { %v535_v23 = vmul.f32 1.442695, %v531_v22 }
 0x2d9   : > { %1959 = vpow2.f32 %v535_v23 }
 0x2dc   : > { %v524_v27 = vpop.xlane.xlu0 %523 }
 0x2dd   : > { %v532_v28 = vsub.f32 %v511_v7, %v524_v27 }
 0x2df   : > { %v1960_v29 = vpop.eup %1959  ;;  %v537_v31 = vmul.f32 1.442695, %v532_v28 }
 0x2e0   : > { %v543_v32 = vsel %vm518_vm6, %v1960_v29, 0.0 }
 0x2e1   : > { %1961 = vpow2.f32 %v537_v31  ;;  %544 = vadd.xlane.f32.xlu1 %v543_v32  ;;  %v1705_v31 = vld [vmem:[%s2848_s3 + $0x20] sm:$0xf] }
 0x2e4   : > { %v527_v33 = vpop.xlane.xlu1 %526 }
 0x2e5   : > { %v533_v34 = vsub.f32 %v514_v12, %v527_v33  ;;  %v1701_v33 = vld [vmem:[%s2848_s3 + $0x8] sm:$0xf] }
 0x2e7   : > { %v1962_v35 = vpop.eup %1961  ;;  %v539_v37 = vmul.f32 1.442695, %v533_v34  ;;  %v1857_v34 = vld [vmem:[%s2848_s3 + $0x10] sm:$0xf0] }
 0x2e8   : > { %v546_v38 = vsel %vm518_vm6, %v1962_v35, 0.0 }
 0x2e9   : > { %1963 = vpow2.f32 %v539_v37  ;;  %547 = vadd.xlane.f32.xlu1 %v546_v38 }
 0x2ec   : > { %v530_v39 = vpop.xlane.xlu2 %529 }
 0x2ed   : > { %v534_v40 = vsub.f32 %v516_v17, %v530_v39 }
 0x2ef   : > { %v1964_v41 = vpop.eup %1963  ;;  %v541_v42 = vmul.f32 1.442695, %v534_v40  ;;  %v470_v44 = vpop.permute.xlu0 %469 }
 0x2f0   : > { %v549_v43 = vsel %vm518_vm6, %v1964_v41, 0.0  ;;  %v475_v46 = vmul.f32 %v470_v44, %v2446_v47 }
 0x2f1   : > { %1965 = vpow2.f32 %v541_v42  ;;  %550 = vadd.xlane.f32.xlu1 %v549_v43 }
 0x2f4   : > { %v472_v45 = vpop.permute.xlu2 %471 }
 0x2f5   : > { %v476_v48 = vmul.f32 %v472_v45, %v2446_v47 }
 0x2f7   : > { %v1966_v49 = vpop.eup %1965  ;;  %v477_v50 = vpack.c.bf16 %v476_v48, %v475_v46  ;;  %v642_v46 = vperm.slane %v2439_v36, 2 }
 0x2f8   : > { %v552_v53 = vsel %vm518_vm6, %v1966_v49, 0.0 }
 0x2f9   : > { %553 = vadd.xlane.f32.xlu2 %v552_v53  ;;  %566 = vrot.lane.b32.xlu0 %v477_v50, %s2206_s7  ;;  %v644_v50 = vperm.slane %v2439_v36, 3 }
 0x301   : > { %600 = vrot.lane.b32.xlu0 %v2397_v6, %s2208_s13 }
 0x30a   : > { %598 = vrot.lane.b32.xlu1 %v2408_v10, %s2208_s13 }
 0x354   : > { %v545_v54 = vpop.xlane.xlu1 %544 }
 0x35c   : > { %v548_v55 = vpop.xlane.xlu1 %547 }
 0x35d   : > { %1967 = vrcp.f32 %v548_v55 }
 0x35e   : > { %1969 = vrcp.f32 %v545_v54 }
 0x363   : > { %v1968_v56 = vpop.eup %1967 }
 0x364   : > { %v1970_v57 = vpop.eup %1969  ;;  %v560_v47 = vmul.f32 %v1968_v56, %v1962_v35  ;;  %v551_v0 = vpop.xlane.xlu1 %550  ;;  %v1702_v35 = vor.u32 %v1857_v34, %v1701_v33  ;;  %v1864_v56 = vld [vmem:[%s2850_s5 + $0x58] sm:$0xff]  ;;  %v1730_v34 = vld [vmem:[%s2849_s4 + $0xc] sm:$0xf0] }
 0x365   : > { %v559_v61 = vmul.f32 %v1970_v57, %v1960_v29  ;;  %v1863_v57 = vld [vmem:[%s2850_s5 + $0x50] sm:$0xff] }
 0x367   : > { %v563_v63 = vpack.c.bf16 %v560_v47, %v559_v61  ;;  %v1862_v47 = vld [vmem:[%s2850_s5 + $0x48] sm:$0xff] }
 0x36b   : > { %v567_v60 = vpop.permute.xlu0 %566 }
 0x36c   : > { %582 = vmatpush.bf16.msra.mxu3 %v567_v60  ;;  %v554_v62 = vpop.xlane.xlu2 %553  ;;  %v1861_v60 = vld [vmem:[%s2850_s5 + $0x40] sm:$0xff] }
 0x36d   : > { %1971 = vrcp.f32 %v554_v62 }
 0x36e   : > { %1973 = vrcp.f32 %v551_v0 }
 0x36f   : > { %1696 = vmatmul.msk.bf16.vlgmr.msra.gmra.mxu3 %vm518_vm6, %v563_v63 }
 0x370   : > { %728 = vmatpush.bf16.msrb.mxu3 %v1864_v56 }
 0x373   : > { %v1972_v6 = vpop.eup %1971  ;;  %v601_v5 = vpop.permute.xlu0 %600 }
 0x374   : > { %v1974_v2 = vpop.eup %1973  ;;  %v562_v10 = vmul.f32 %v1972_v6, %v1966_v49  ;;  %613 = vmatpush.bf16.msrb.mxu0 %v601_v5  ;;  %729 = vmatpush.bf16.msrb.mxu3 %v1863_v57 }
 0x375   : > { %v561_v3 = vmul.f32 %v1974_v2, %v1964_v41 }
 0x377   : > { %v564_v4 = vpack.c.bf16 %v562_v10, %v561_v3 }
 0x378   : > { %730 = vmatpush.bf16.msrb.mxu3 %v1862_v47 }
 0x37c   : > { %v599_v7 = vpop.permute.xlu1 %598  ;;  %731 = vmatpush.bf16.msrb.mxu3 %v1861_v60 }
 0x37d   : > { %614 = vmatpush.bf16.msrb.mxu0 %v599_v7 }
 0x37f   : > { %1697 = vmatmul.msk.bf16.gmra.mxu3 %vm518_vm6, %v564_v4 }
 0x3f2   : > { %v584_v8 = vpop.f32.mrf.mxu3 }
 0x3fa   : > { %v586_v9 = vpop.f32.mrf.mxu3 }
 0x3fb   : > { %v594_v12 = vadd.f32 %v586_v9, %v584_v8 }
 0x402   : > { %v589_v11 = vpop.f32.mrf.mxu3 }
 0x403   : > { %v595_v13 = vadd.f32 %v594_v12, %v589_v11 }
 0x40a   : > { %v591_v14 = vpop.f32.mrf.mxu3 }
 0x40b   : > { %v596_v16 = vadd.f32 %v595_v13, %v591_v14 }
 0x40d   : > { %v597_v17 = vpack.c.bf16 %v596_v16, %v596_v16 }
 0x40f   : > { %1698 = vmatmul.msk.bf16.vlgmr.msrb.gmra.mxu0 %vm354_vm0, %v597_v17 }
 0x48c   : > { %v616_v18 = vpop.f32.mrf.mxu0 }
 0x48d   : > { %v2486_v19 = vadd.f32 %v616_v18, %v2387_v1  ;;  %v1860_v1 = vld [vmem:[%s2848_s3 + $0x28] sm:$0xf0] }
 0x48e   : > { %v1706_v32 = vor.u32 %v1860_v1, %v1705_v31  ;;  %v1728_v31 = vld [vmem:[%s2849_s4] sm:$0xf]  ;;  %v1866_v1 = vld [vmem:[%s2849_s4 + $0x8] sm:$0xf0] }
 0x48f   : > { %v620_v20 = vsel %vm354_vm0, %v2486_v19, 0.0  ;;  %v1729_v33 = vor.u32 %v1866_v1, %v1728_v31 }
 0x490   : > { %621 = vadd.xlane.f32.xlu0 %v620_v20  ;;  %668 = vmatpush.bf16.msrb.mxu1 %v1706_v32  ;;  %v1865_v32 = vld [vmem:[%s2849_s4 + $0x4] sm:$0xf] }
 0x494   : > { %v618_v21 = vpop.f32.mrf.mxu0  ;;  %669 = vmatpush.bf16.msrb.mxu1 %v1702_v35  ;;  %v2555_v35 = vor.u32 %v1865_v32, %v1730_v34 }
 0x503   : > { %v622_v22 = vpop.xlane.xlu0 %621 }
 0x504   : > { %v623_v23 = vmul.f32 %v622_v22, %v2413_v15  ;;  %v1736_v22 = vld [vmem:[%s2849_s4 + $0x18] sm:$0xf] }
 0x506   : > { %v624_v27 = vsub.f32 %v2486_v19, %v623_v23  ;;  %v1869_v23 = vld [vmem:[%s2849_s4 + $0x20] sm:$0xf0] }
 0x508   : > { %v625_v28 = vmul.f32 %v624_v27, %v624_v27 }
 0x50a   : > { %v626_v29 = vsel %vm354_vm0, %v625_v28, 0.0  ;;  %v1738_v28 = vld [vmem:[%s2849_s4 + $0x24] sm:$0xf0] }
 0x50b   : > { %627 = vadd.xlane.f32.xlu1 %v626_v29 }
 0x57e   : > { %v628_v37 = vpop.xlane.xlu1 %627 }
 0x57f   : > { %v629_v38 = vmul.f32 %v628_v37, %v2413_v15  ;;  %v2558_v37 = vld [vmem:[#allocation7] sm:$0xff] }
 0x581   : > { %v630_v39 = vadd.f32 1e-05, %v629_v38 }
 0x583   : > { %1975 = vrsqrt.f32 %v630_v39  ;;  %vm637_vm8 = vweird.f32 %v630_v39 }
 0x589   : > { %v1976_v40 = vpop.eup %1975 }
 0x58a   : > { %v632_v41 = vmul.f32 %v1976_v40, %v630_v39  ;;  %vm638_vm7 = vweird.f32 %v1976_v40 }
 0x58b   : > { %vm639_vm9 = vmor %vm637_vm8, %vm638_vm7 }
 0x58c   : > { %v633_v42 = vmul.f32 %v1976_v40, %v632_v41 }
 0x58e   : > { %v634_v43 = vmul.f32 0.5, %v633_v42 }
 0x590   : > { %v635_v44 = vsub.f32 1.5, %v634_v43 }
 0x592   : > { %v636_v45 = vmul.f32 %v1976_v40, %v635_v44 }
 0x594   : > { %v640_v48 = vsel %vm639_vm9, %v1976_v40, %v636_v45 }
 0x595   : > { %v641_v49 = vmul.f32 %v640_v48, %v624_v27  ;;  %v1737_v27 = vor.u32 %v1869_v23, %v1736_v22  ;;  %v762_v48 = vperm.slane %v2439_v36, 5 }
 0x597   : > { %v643_v53 = vmul.f32 %v642_v46, %v641_v49  ;;  %794 = vmatpush.bf16.msra.mxu0 %v1737_v27 }
 0x599   : > { %v645_v54 = vadd.f32 %v644_v50, %v643_v53 }
 0x59b   : > { %v646_v55 = vpack.c.bf16 %v645_v54, %v645_v54  ;;  %795 = vmatpush.bf16.msra.mxu0 %v1729_v33 }
 0x59d   : > { %1707 = vmatmul.msk.bf16.vlgmr.msrb.gmra.mxu1 %vm354_vm0, %v646_v55 }
 0x61a   : > { %v671_v61 = vpop.f32.mrf.mxu1 }
 0x61b   : > { %v1708_v62 = vmul.f32 -1.442695, %v671_v61 }
 0x61d   : > { %1977 = vpow2.f32 %v1708_v62 }
 0x622   : > { %v673_v63 = vpop.f32.mrf.mxu1 }
 0x623   : > { %v1978_v0 = vpop.eup %1977 }
 0x624   : > { %v678_v6 = vadd.f32 1.0, %v1978_v0 }
 0x626   : > { %1979 = vrcp.f32 %v678_v6  ;;  %v690_v4 = vand.u32 2147483648, %v678_v6  ;;  %v688_v7 = vand.u32 2147483647, %v678_v6  ;;  %vm684_vm11 = vweird.f32 %v678_v6 }
 0x628   : > { %v691_v9 = vor.u32 1.1754944e-38, %v690_v4  ;;  %vm689_vm13 = vcmp.eq.f32.partialorder %v688_v7, 8.507059e+37 }
 0x62c   : > { %v1980_v2 = vpop.eup %1979 }
 0x62d   : > { %v680_v10 = vmul.f32 %v1980_v2, %v678_v6  ;;  %vm685_vm10 = vweird.f32 %v1980_v2 }
 0x62e   : > { %vm686_vm12 = vmor %vm684_vm11, %vm685_vm10 }
 0x62f   : > { %v681_v3 = vsub.f32 1.0, %v680_v10 }
 0x631   : > { %v682_v5 = vmul.f32 %v1980_v2, %v681_v3 }
 0x633   : > { %v683_v8 = vadd.f32 %v1980_v2, %v682_v5 }
 0x635   : > { %v687_v11 = vsel %vm686_vm12, %v1980_v2, %v683_v8 }
 0x636   : > { %v692_v12 = vsel %vm689_vm13, %v691_v9, %v687_v11 }
 0x637   : > { %v694_v13 = vmul.f32 %v692_v12, %v671_v61 }
 0x639   : > { %v695_v14 = vpack.c.bf16 %v694_v13, %v694_v13 }
 0x63b   : > { %1725 = vmatmul.msk.bf16.vlgmr.msrb.gmra.mxu3 %vm720_vm14, %v695_v14 }
 0x6be   : > { %v733_v16 = vpop.f32.mrf.mxu3 }
 0x6bf   : > { %v2523_v17 = vadd.f32 %v733_v16, %v2486_v19  ;;  %v1868_v19 = vld [vmem:[%s2849_s4 + $0x1c] sm:$0xf] }
 0x6c0   : > { %v2540_v29 = vor.u32 %v1868_v19, %v1738_v28 }
 0x6c1   : > { %v745_v18 = vmul.f32 %v2523_v17, %v2523_v17 }
 0x6c2   : > { %807 = vmatpush.bf16.msra.mxu1 %v2540_v29 }
 0x6c3   : > { %v746_v20 = vsel %vm354_vm0, %v745_v18, 0.0 }
 0x6c4   : > { %747 = vadd.xlane.f32.xlu2 %v746_v20 }
 0x6c6   : > { %v735_v21 = vpop.f32.mrf.mxu3  ;;  %808 = vmatpush.bf16.msra.mxu1 %v2555_v35 }
 0x6dc   : > { %816 = vrot.lane.b32.xlu2 %v2558_v37, %s2208_s13 }
 0x737   : > { %v748_v38 = vpop.xlane.xlu2 %747 }
 0x738   : > { %v749_v39 = vmul.f32 %v748_v38, %v2413_v15 }
 0x73a   : > { %v750_v40 = vadd.f32 1e-06, %v749_v39 }
 0x73c   : > { %1981 = vrsqrt.f32 %v750_v40  ;;  %vm757_vm1 = vweird.f32 %v750_v40 }
 0x73f   : > { %v2567_v55 = vpop.permute.xlu2 %816 }
 0x742   : > { %v1982_v41 = vpop.eup %1981 }
 0x743   : > { %v752_v42 = vmul.f32 %v1982_v41, %v750_v40  ;;  %vm758_vm15 = vweird.f32 %v1982_v41 }
 0x744   : > { %vm759_vm2 = vmor %vm757_vm1, %vm758_vm15 }
 0x745   : > { %v753_v43 = vmul.f32 %v1982_v41, %v752_v42 }
 0x747   : > { %v754_v44 = vmul.f32 0.5, %v753_v43 }
 0x749   : > { %v755_v45 = vsub.f32 1.5, %v754_v44 }
 0x74b   : > { %v756_v46 = vmul.f32 %v1982_v41, %v755_v45 }
 0x74d   : > { %v760_v49 = vsel %vm759_vm2, %v1982_v41, %v756_v46 }
 0x74e   : > { %v761_v50 = vmul.f32 %v760_v49, %v2523_v17 }
 0x750   : > { %v763_v53 = vmul.f32 %v762_v48, %v761_v50 }
 0x752   : > { %v764_v54 = vpack.c.bf16 %v763_v53, %v763_v53 }
 0x754   : > { %1742 = vmatmul.msk.bf16.vlgmr.msra.gmra.mxu0 %vm354_vm0, %v764_v54  ;;  %1743 = vmatmul.msk.bf16.vlgmr.msra.gmra.mxu1 %vm354_vm0, %v764_v54 }
 0x7d1   : > { %v2569_v56 = vpop.f32.mrf.mxu0  ;;  %v810_v57 = vpop.f32.mrf.mxu1 }
 0x7d2   : > { %v820_v47 = vmul.f32 %v2567_v55, %v810_v57  ;;  %v819_v60 = vmul.f32 %v2567_v55, %v2569_v56  ;;  %v814_v0 = vmul.f32 %v2569_v56, %v2558_v37 }
 0x7d4   : > { %823 = vrot.lane.b32.xlu0 %v819_v60, %s2208_s13  ;;  %825 = vrot.lane.b32.xlu1 %v820_v47, %s2208_s13 }
 0x7d9   : > { %v799_v61 = vpop.f32.mrf.mxu0  ;;  %v812_v62 = vpop.f32.mrf.mxu1 }
 0x7dc   : > { %841 = vrot.lane.b32.xlu1 %v2422_v25, %s2209_s2 }
 0x7e4   : > { %843 = vrot.lane.b32.xlu1 %v2420_v24, %s2209_s2 }
 0x846   : > { %v824_v63 = vpop.permute.xlu0 %823  ;;  %v826_v6 = vpop.permute.xlu1 %825 }
 0x847   : > { %v827_v2 = vsel %vm354_vm0, %v824_v63, %v826_v6 }
 0x848   : > { %v829_v10 = vadd.f32 %v827_v2, %v814_v0 }
 0x84a   : > { %v836_v3 = vpack.c.bf16 %v829_v10, %v829_v10  ;;  %v830_v7 = vmul.f32 %v829_v10, %v2451_v51  ;;  %v831_v8 = vmul.f32 %v829_v10, %v2453_v52  ;;  %v832_v11 = vmul.f32 %v829_v10, %v2460_v59 }
 0x84b   : > { %v833_v12 = vmul.f32 %v829_v10, %v2458_v58 }
 0x84c   : > { %856 = vrot.lane.b32.xlu0 %v836_v3, %s2206_s7  ;;  %v834_v9 = vpack.c.bf16 %v831_v8, %v830_v7 }
 0x84d   : > { %v835_v13 = vpack.c.bf16 %v833_v12, %v832_v11 }
 0x84e   : > { %v2598_v1 = vpop.permute.xlu1 %841 }
 0x856   : > { %v2603_v33 = vpop.permute.xlu1 %843 }
 0x857   : > { %v852_v34 = vmul.f32 %v2603_v33, %v2569_v56 }
 0x8be   : > { %v857_v4 = vpop.permute.xlu0 %856 }
 0x8bf   : > { %v865_v5 = vsel %vm354_vm0, %v857_v4, 0 }
 0x8c0   : > { %873 = vmatpush.bf16.xpose.msrb.mxu2 %v865_v5 }
 0x8c8   : > { %874 = vmatpush.bf16.xpose.msrb.mxu2 %v865_v5 }
 0x8cf   : > { %1744 = vmatmul.msk.bf16.vlgmr.msrb.gmra.mxu2 %vm354_vm0, %v834_v9 }
 0x8df   : > { %1745 = vmatmul.msk.bf16.gmra.mxu2 %vm354_vm0, %v835_v13 }
 0x952   : > { %v876_v14 = vpop.f32.mrf.mxu2 }
 0x953   : > { %v877_v16 = vadd.f32 %v876_v14, %v2424_v26 }
 0x955   : > { %v886_v18 = vsel %vm354_vm0, %v877_v16, -inf }
 0x956   : > { %887 = vmax.xlane.f32.xlu2 %v886_v18 }
 0x95a   : > { %v878_v20 = vpop.f32.mrf.mxu2 }
 0x95b   : > { %v879_v21 = vadd.f32 %v878_v20, %v2430_v30 }
 0x95d   : > { %v889_v22 = vsel %vm354_vm0, %v879_v21, -inf }
 0x95e   : > { %890 = vmax.xlane.f32.xlu0 %v889_v22 }
 0x962   : > { %v881_v23 = vpop.f32.mrf.mxu2 }
 0x963   : > { %v882_v19 = vadd.f32 %v881_v23, %v2422_v25  ;;  %v851_v25 = vmul.f32 %v2598_v1, %v2569_v56 }
 0x965   : > { %v892_v27 = vsel %vm354_vm0, %v882_v19, -inf  ;;  %v854_v38 = vpack.c.bf16 %v852_v34, %v851_v25  ;;  %v1755_v25 = vld [vmem:[%s2849_s4 + $0x20] sm:$0xf] }
 0x966   : > { %893 = vmax.xlane.f32.xlu1 %v892_v27 }
 0x96a   : > { %v883_v28 = vpop.f32.mrf.mxu2 }
 0x96b   : > { %v884_v31 = vadd.f32 %v883_v28, %v2420_v24 }
 0x96d   : > { %v895_v32 = vsel %vm354_vm0, %v884_v31, -inf }
 0x96e   : > { %896 = vmax.xlane.f32.xlu2 %v895_v32 }
 0x972   : > { %837 = vrot.lane.b32.xlu0 %v2424_v26, %s2209_s2 }
 0x97f   : > { %936 = vrot.lane.b32.xlu1 %v854_v38, %s2210_s9  ;;  %v1870_v38 = vld [vmem:[%s2849_s4 + $0x28] sm:$0xf0] }
 0x986   : > { %839 = vrot.lane.b32.xlu2 %v2430_v30, %s2209_s2 }
 0x9c9   : > { %v888_v24 = vpop.xlane.xlu2 %887 }
 0x9ca   : > { %v898_v39 = vsub.f32 %v877_v16, %v888_v24  ;;  %v1756_v24 = vor.u32 %v1870_v38, %v1755_v25 }
 0x9cc   : > { %v902_v40 = vmul.f32 1.442695, %v898_v39  ;;  %v1751_v39 = vld [vmem:[%s2849_s4 + $0x8] sm:$0xf] }
 0x9ce   : > { %1983 = vpow2.f32 %v902_v40  ;;  %v1867_v40 = vld [vmem:[%s2849_s4 + $0x10] sm:$0xf0] }
 0x9d1   : > { %v891_v26 = vpop.xlane.xlu0 %890 }
 0x9d2   : > { %v899_v41 = vsub.f32 %v879_v21, %v891_v26  ;;  %v1752_v26 = vor.u32 %v1867_v40, %v1751_v39 }
 0x9d4   : > { %v1984_v42 = vpop.eup %1983  ;;  %v904_v43 = vmul.f32 1.442695, %v899_v41 }
 0x9d5   : > { %v910_v44 = vsel %vm354_vm0, %v1984_v42, 0.0 }
 0x9d6   : > { %1985 = vpow2.f32 %v904_v43  ;;  %911 = vadd.xlane.f32.xlu0 %v910_v44 }
 0x9d9   : > { %v894_v45 = vpop.xlane.xlu1 %893 }
 0x9da   : > { %v900_v46 = vsub.f32 %v882_v19, %v894_v45 }
 0x9dc   : > { %v1986_v48 = vpop.eup %1985  ;;  %v906_v49 = vmul.f32 1.442695, %v900_v46 }
 0x9dd   : > { %v913_v50 = vsel %vm354_vm0, %v1986_v48, 0.0 }
 0x9de   : > { %1987 = vpow2.f32 %v906_v49  ;;  %914 = vadd.xlane.f32.xlu2 %v913_v50 }
 0x9e1   : > { %v897_v30 = vpop.xlane.xlu2 %896 }
 0x9e2   : > { %v901_v0 = vsub.f32 %v884_v31, %v897_v30 }
 0x9e4   : > { %v1988_v53 = vpop.eup %1987  ;;  %v2615_v57 = vpop.permute.xlu0 %837  ;;  %v908_v6 = vmul.f32 1.442695, %v901_v0 }
 0x9e5   : > { %v916_v54 = vsel %vm354_vm0, %v1988_v53, 0.0  ;;  %v849_v60 = vmul.f32 %v2615_v57, %v2569_v56 }
 0x9e6   : > { %917 = vadd.xlane.f32.xlu0 %v916_v54  ;;  %1989 = vpow2.f32 %v908_v6 }
 0x9e9   : > { %v2617_v47 = vpop.permute.xlu2 %839 }
 0x9ea   : > { %v850_v61 = vmul.f32 %v2617_v47, %v2569_v56 }
 0x9ec   : > { %v853_v62 = vpack.c.bf16 %v850_v61, %v849_v60  ;;  %v1990_v2 = vpop.eup %1989 }
 0x9ed   : > { %v919_v56 = vsel %vm354_vm0, %v1990_v2, 0.0 }
 0x9ee   : > { %934 = vrot.lane.b32.xlu1 %v853_v62, %s2210_s9 }
 0x9f1   : > { %v937_v63 = vpop.permute.xlu1 %936 }
 0x9f2   : > { %952 = vmatpush.bf16.msra.mxu3 %v937_v63 }
 0x9f6   : > { %971 = vrot.lane.b32.xlu2 %v2540_v29, %s2206_s7 }
 0x9fa   : > { %969 = vrot.lane.b32.xlu0 %v2555_v35, %s2206_s7 }
 0x9fe   : > { %1026 = vrot.lane.b32.xlu2 %v2540_v29, %s2210_s9 }
 0xa06   : > { %1028 = vrot.lane.b32.xlu2 %v1756_v24, %s2210_s9 }
 0xa0e   : > { %1024 = vrot.lane.b32.xlu2 %v1752_v26, %s2210_s9 }
 0xa18   : > { %920 = vadd.xlane.f32.xlu1 %v919_v56  ;;  %v1009_v56 = vperm.slane %v2439_v36, 7 }
 0xa31   : > { %1022 = vrot.lane.b32.xlu1 %v2555_v35, %s2210_s9 }
 0xa49   : > { %v912_v3 = vpop.xlane.xlu0 %911 }
 0xa51   : > { %v915_v10 = vpop.xlane.xlu2 %914 }
 0xa52   : > { %1991 = vrcp.f32 %v915_v10 }
 0xa53   : > { %1993 = vrcp.f32 %v912_v3 }
 0xa58   : > { %v1992_v4 = vpop.eup %1991 }
 0xa59   : > { %v1994_v5 = vpop.eup %1993  ;;  %v927_v7 = vmul.f32 %v1992_v4, %v1986_v48  ;;  %v918_v11 = vpop.xlane.xlu0 %917 }
 0xa5a   : > { %v926_v8 = vmul.f32 %v1994_v5, %v1984_v42  ;;  %1995 = vrcp.f32 %v918_v11  ;;  %v972_v20 = vpop.permute.xlu2 %971 }
 0xa5b   : > { %984 = vmatpush.bf16.msrb.mxu0 %v972_v20 }
 0xa5c   : > { %v930_v29 = vpack.c.bf16 %v927_v7, %v926_v8  ;;  %v1874_v7 = vld [vmem:[%s2850_s5 + $0x18] sm:$0xff]  ;;  %v1873_v8 = vld [vmem:[%s2850_s5 + $0x10] sm:$0xff] }
 0xa60   : > { %v935_v9 = vpop.permute.xlu1 %934  ;;  %v1996_v13 = vpop.eup %1995 }
 0xa61   : > { %953 = vmatpush.bf16.msra.mxu3 %v935_v9  ;;  %v928_v35 = vmul.f32 %v1996_v13, %v1988_v53  ;;  %v1872_v9 = vld [vmem:[%s2850_s5 + $0x8] sm:$0xff] }
 0xa62   : > { %v1027_v46 = vpop.permute.xlu2 %1026 }
 0xa64   : > { %1746 = vmatmul.msk.bf16.vlgmr.msra.gmra.mxu3 %vm354_vm0, %v930_v29 }
 0xa6a   : > { %v1029_v48 = vpop.permute.xlu2 %1028 }
 0xa6b   : > { %v1032_v49 = vsel %vm720_vm14, %v1027_v46, %v1029_v48  ;;  %v1879_v46 = vld [vmem:[%s2849_s4 + $0x50] sm:$0xf0] }
 0xa6c   : > { %v970_v21 = vpop.permute.xlu0 %969  ;;  %1044 = vmatpush.bf16.msrb.mxu1 %v1032_v49  ;;  %v1786_v49 = vld [vmem:[%s2849_s4 + $0x30] sm:$0xf] }
 0xa6d   : > { %985 = vmatpush.bf16.msrb.mxu0 %v970_v21 }
 0xa71   : > { %1116 = vmatpush.bf16.msra.mxu0 %v1874_v7 }
 0xa72   : > { %v1025_v50 = vpop.permute.xlu2 %1024 }
 0xa75   : > { %1117 = vmatpush.bf16.msra.mxu0 %v1873_v8 }
 0xa79   : > { %1118 = vmatpush.bf16.msra.mxu0 %v1872_v9 }
 0xa8b   : > { %v921_v12 = vpop.xlane.xlu1 %920 }
 0xa8c   : > { %1997 = vrcp.f32 %v921_v12 }
 0xa92   : > { %v1998_v14 = vpop.eup %1997 }
 0xa93   : > { %v929_v16 = vmul.f32 %v1998_v14, %v1990_v2 }
 0xa95   : > { %v931_v18 = vpack.c.bf16 %v929_v16, %v928_v35  ;;  %v1871_v35 = vld [vmem:[%s2850_s5] sm:$0xff] }
 0xa96   : > { %1119 = vmatpush.bf16.msra.mxu0 %v1871_v35 }
 0xa97   : > { %1747 = vmatmul.msk.bf16.gmra.mxu3 %vm354_vm0, %v931_v18 }
 0xaa3   : > { %v1023_v30 = vpop.permute.xlu1 %1022 }
 0xaa4   : > { %v1031_v53 = vsel %vm720_vm14, %v1023_v30, %v1025_v50  ;;  %v1876_v50 = vld [vmem:[%s2849_s4 + $0x38] sm:$0xf0]  ;;  %v1875_v30 = vld [vmem:[%s2849_s4 + $0x34] sm:$0xf] }
 0xaa5   : > { %1045 = vmatpush.bf16.msrb.mxu1 %v1031_v53  ;;  %v1787_v53 = vor.u32 %v1876_v50, %v1786_v49 }
 0xae7   : > { %v955_v22 = vpop.f32.mrf.mxu3 }
 0xaef   : > { %v957_v23 = vpop.f32.mrf.mxu3 }
 0xaf0   : > { %v965_v27 = vadd.f32 %v957_v23, %v955_v22 }
 0xb1a   : > { %v960_v19 = vpop.f32.mrf.mxu3 }
 0xb1b   : > { %v966_v28 = vadd.f32 %v965_v27, %v960_v19 }
 0xb22   : > { %v962_v31 = vpop.f32.mrf.mxu3 }
 0xb23   : > { %v967_v32 = vadd.f32 %v966_v28, %v962_v31 }
 0xb25   : > { %v968_v34 = vpack.c.bf16 %v967_v32, %v967_v32 }
 0xb27   : > { %1748 = vmatmul.msk.bf16.vlgmr.msrb.gmra.mxu0 %vm354_vm0, %v968_v34 }
 0xba4   : > { %v987_v41 = vpop.f32.mrf.mxu0 }
 0xba5   : > { %v2651_v42 = vadd.f32 %v987_v41, %v2523_v17 }
 0xba7   : > { %v992_v43 = vmul.f32 %v2651_v42, %v2651_v42 }
 0xba9   : > { %v993_v44 = vsel %vm354_vm0, %v992_v43, 0.0  ;;  %v1878_v43 = vld [vmem:[%s2849_s4 + $0x4c] sm:$0xf] }
 0xbaa   : > { %994 = vadd.xlane.f32.xlu0 %v993_v44  ;;  %v1796_v44 = vld [vmem:[%s2849_s4 + $0x54] sm:$0xf0] }
 0xbac   : > { %v989_v45 = vpop.f32.mrf.mxu0 }
 0xbad   : > { %v2691_v45 = vor.u32 %v1878_v43, %v1796_v44 }
 0xbaf   : > { %1197 = vmatpush.bf16.msra.mxu2 %v2691_v45 }
 0xc1d   : > { %v995_v54 = vpop.xlane.xlu0 %994 }
 0xc1e   : > { %v996_v17 = vmul.f32 %v995_v54, %v2413_v15  ;;  %v1788_v54 = vld [vmem:[%s2849_s4 + $0x3c] sm:$0xf0] }
 0xc20   : > { %v997_v60 = vadd.f32 1e-06, %v996_v17  ;;  %v2709_v17 = vor.u32 %v1875_v30, %v1788_v54 }
 0xc22   : > { %1999 = vrsqrt.f32 %v997_v60  ;;  %vm1004_vm4 = vweird.f32 %v997_v60  ;;  %1198 = vmatpush.bf16.msra.mxu2 %v2709_v17 }
 0xc28   : > { %v2000_v61 = vpop.eup %1999 }
 0xc29   : > { %v999_v62 = vmul.f32 %v2000_v61, %v997_v60  ;;  %vm1005_vm3 = vweird.f32 %v2000_v61 }
 0xc2a   : > { %vm1006_vm5 = vmor %vm1004_vm4, %vm1005_vm3 }
 0xc2b   : > { %v1000_v63 = vmul.f32 %v2000_v61, %v999_v62 }
 0xc2d   : > { %v1001_v0 = vmul.f32 0.5, %v1000_v63 }
 0xc2f   : > { %v1002_v6 = vsub.f32 1.5, %v1001_v0 }
 0xc31   : > { %v1003_v2 = vmul.f32 %v2000_v61, %v1002_v6 }
 0xc33   : > { %v1007_v10 = vsel %vm1006_vm5, %v2000_v61, %v1003_v2 }
 0xc34   : > { %v1008_v3 = vmul.f32 %v1007_v10, %v2651_v42 }
 0xc36   : > { %v1010_v4 = vmul.f32 %v1009_v56, %v1008_v3  ;;  %v1152_v3 = vperm.slane %v2439_v36, 6 }
 0xc38   : > { %v1011_v5 = vpack.c.bf16 %v1010_v4, %v1010_v4 }
 0xc3a   : > { %1757 = vmatmul.msk.bf16.vlgmr.msrb.gmra.mxu1 %vm354_vm0, %v1011_v5 }
 0xcb7   : > { %v1047_v29 = vpop.f32.mrf.mxu1 }
 0xcb8   : > { %1072 = vrot.lane.b32.xlu2 %v1047_v29, %s2210_s9  ;;  %v1758_v12 = vmul.f32 -1.442695, %v1047_v29 }
 0xcba   : > { %2001 = vpow2.f32 %v1758_v12 }
 0xcbf   : > { %v1049_v11 = vpop.f32.mrf.mxu1 }
 0xcc0   : > { %v2002_v13 = vpop.eup %2001 }
 0xcc1   : > { %v1054_v14 = vadd.f32 1.0, %v2002_v13 }
 0xcc3   : > { %2003 = vrcp.f32 %v1054_v14  ;;  %v1066_v23 = vand.u32 2147483648, %v1054_v14  ;;  %vm1060_vm7 = vweird.f32 %v1054_v14  ;;  %v1064_v19 = vand.u32 2147483647, %v1054_v14 }
 0xcc5   : > { %v1067_v28 = vor.u32 1.1754944e-38, %v1066_v23  ;;  %vm1065_vm9 = vcmp.eq.f32.partialorder %v1064_v19, 8.507059e+37 }
 0xcc9   : > { %v2004_v16 = vpop.eup %2003 }
 0xcca   : > { %v1056_v18 = vmul.f32 %v2004_v16, %v1054_v14  ;;  %vm1061_vm6 = vweird.f32 %v2004_v16 }
 0xccb   : > { %vm1062_vm8 = vmor %vm1060_vm7, %vm1061_vm6 }
 0xccc   : > { %v1057_v20 = vsub.f32 1.0, %v1056_v18 }
 0xcce   : > { %v1058_v21 = vmul.f32 %v2004_v16, %v1057_v20 }
 0xcd0   : > { %v1059_v22 = vadd.f32 %v2004_v16, %v1058_v21 }
 0xcd2   : > { %v1063_v27 = vsel %vm1062_vm8, %v2004_v16, %v1059_v22 }
 0xcd3   : > { %v1068_v31 = vsel %vm1065_vm9, %v1067_v28, %v1063_v27 }
 0xcd4   : > { %v1070_v32 = vmul.f32 %v1068_v31, %v1047_v29 }
 0xd12   : > { %v1073_v34 = vpop.permute.xlu2 %1072 }
 0xd13   : > { %v1075_v25 = vmul.f32 %v1073_v34, %v1070_v32  ;;  %v2031_v34 = vld [vmem:[#allocation7 + $0x8] sm:$0xff] }
 0xd15   : > { %v1076_v38 = vpack.c.bf16 %v1075_v25, %v1075_v25 }
 0xd17   : > { %1775 = vmatmul.msk.bf16.vlgmr.msra.gmra.mxu0 %vm720_vm14, %v1076_v38 }
 0xd94   : > { %v1121_v24 = vpop.f32.mrf.mxu0 }
 0xd95   : > { %v2677_v39 = vadd.f32 %v1121_v24, %v2651_v42  ;;  %v1794_v42 = vld [vmem:[%s2849_s4 + $0x48] sm:$0xf] }
 0xd96   : > { %v1795_v48 = vor.u32 %v1879_v46, %v1794_v42  ;;  %v2034_v46 = vld [vmem:[#allocation7 + $0x20] sm:$0xff] }
 0xd97   : > { %v1135_v40 = vmul.f32 %v2677_v39, %v2677_v39 }
 0xd98   : > { %1184 = vmatpush.bf16.msra.mxu1 %v1795_v48 }
 0xd99   : > { %v1136_v26 = vsel %vm354_vm0, %v1135_v40, 0.0 }
 0xd9a   : > { %1137 = vadd.xlane.f32.xlu2 %v1136_v26 }
 0xd9c   : > { %v1123_v41 = vpop.f32.mrf.mxu0  ;;  %1185 = vmatpush.bf16.msra.mxu1 %v1787_v53 }
 0xd9d   : > { %v2033_v41 = vld [vmem:[#allocation7 + $0x18] sm:$0xff] }
 0xe0d   : > { %v1138_v60 = vpop.xlane.xlu2 %1137 }
 0xe0e   : > { %v1139_v61 = vmul.f32 %v1138_v60, %v2413_v15 }
 0xe10   : > { %v1140_v62 = vadd.f32 1e-06, %v1139_v61 }
 0xe12   : > { %2005 = vrsqrt.f32 %v1140_v62  ;;  %vm1147_vm11 = vweird.f32 %v1140_v62 }
 0xe18   : > { %v2006_v63 = vpop.eup %2005 }
 0xe19   : > { %v1142_v0 = vmul.f32 %v2006_v63, %v1140_v62  ;;  %vm1148_vm10 = vweird.f32 %v2006_v63 }
 0xe1a   : > { %vm1149_vm12 = vmor %vm1147_vm11, %vm1148_vm10 }
 0xe1b   : > { %v1143_v6 = vmul.f32 %v2006_v63, %v1142_v0 }
 0xe1d   : > { %v1144_v2 = vmul.f32 0.5, %v1143_v6 }
 0xe1f   : > { %v1145_v56 = vsub.f32 1.5, %v1144_v2 }
 0xe21   : > { %v1146_v10 = vmul.f32 %v2006_v63, %v1145_v56 }
 0xe23   : > { %v1150_v4 = vsel %vm1149_vm12, %v2006_v63, %v1146_v10 }
 0xe24   : > { %v1151_v5 = vmul.f32 %v1150_v4, %v2677_v39 }
 0xe26   : > { %v1153_v7 = vmul.f32 %v1152_v3, %v1151_v5 }
 0xe28   : > { %v1154_v8 = vpack.c.bf16 %v1153_v7, %v1153_v7 }
 0xe2a   : > { %1800 = vmatmul.msk.bf16.vlgmr.msra.gmra.mxu1 %vm354_vm0, %v1154_v8  ;;  %1801 = vmatmul.msk.bf16.vlgmr.msra.gmra.mxu2 %vm354_vm0, %v1154_v8 }
 0xea7   : > { %v1187_v9 = vpop.f32.mrf.mxu1 }
 0xea8   : > { %v1205_v29 = vmul.f32 %v1187_v9, %v2567_v55  ;;  %v1204_v16 = vmul.f32 %v1187_v9, %v2558_v37  ;;  %v1225_v43 = vmul.f32 %v1187_v9, %v2598_v1  ;;  %v1226_v44 = vmul.f32 %v1187_v9, %v2603_v33 }
 0xea9   : > { %v1223_v49 = vmul.f32 %v1187_v9, %v2615_v57  ;;  %v1224_v50 = vmul.f32 %v1187_v9, %v2617_v47 }
 0xeaa   : > { %1209 = vrot.lane.b32.xlu1 %v1205_v29, %s2208_s13  ;;  %v1228_v53 = vpack.c.bf16 %v1226_v44, %v1225_v43 }
 0xeab   : > { %v1227_v54 = vpack.c.bf16 %v1224_v50, %v1223_v49 }
 0xead   : > { %v1200_v11 = vpop.f32.mrf.mxu2 }
 0xeae   : > { %v1206_v12 = vmul.f32 %v1200_v11, %v2567_v55 }
 0xeaf   : > { %v1189_v13 = vpop.f32.mrf.mxu1 }
 0xeb0   : > { %1211 = vrot.lane.b32.xlu0 %v1206_v12, %s2208_s13 }
 0xeb5   : > { %v1202_v36 = vpop.f32.mrf.mxu2 }
 0xf1c   : > { %v1210_v14 = vpop.permute.xlu1 %1209 }
 0xf22   : > { %v1212_v35 = vpop.permute.xlu0 %1211 }
 0xf23   : > { %v1213_v18 = vsel %vm354_vm0, %v1210_v14, %v1212_v35 }
 0xf24   : > { %v1215_v20 = vadd.f32 %v1213_v18, %v1204_v16 }
 0xf26   : > { %v1222_v21 = vpack.c.bf16 %v1215_v20, %v1215_v20  ;;  %v1216_v55 = vmul.f32 %v1215_v20, %v2451_v51  ;;  %v1217_v19 = vmul.f32 %v1215_v20, %v2453_v52  ;;  %v1218_v37 = vmul.f32 %v1215_v20, %v2460_v59  ;;  %v2032_v51 = vld [vmem:[#allocation7 + $0x10] sm:$0xff] }
 0xf27   : > { %v1219_v28 = vmul.f32 %v1215_v20, %v2458_v58 }
 0xf28   : > { %1230 = vrot.lane.b32.xlu1 %v1222_v21, %s2206_s7  ;;  %v1220_v27 = vpack.c.bf16 %v1217_v19, %v1216_v55 }
 0xf29   : > { %v1221_v31 = vpack.c.bf16 %v1219_v28, %v1218_v37 }
 0xf9a   : > { %v1231_v22 = vpop.permute.xlu1 %1230 }
 0xf9b   : > { %v1239_v23 = vsel %vm354_vm0, %v1231_v22, 0 }
 0xf9c   : > { %1247 = vmatpush.bf16.xpose.msrb.mxu3 %v1239_v23 }
 0xfa4   : > { %1248 = vmatpush.bf16.xpose.msrb.mxu3 %v1239_v23 }
 0xfab   : > { %1802 = vmatmul.msk.bf16.vlgmr.msrb.gmra.mxu3 %vm354_vm0, %v1220_v27 }
 0xfbb   : > { %1803 = vmatmul.msk.bf16.gmra.mxu3 %vm354_vm0, %v1221_v31 }
0x102e   : > { %v1250_v32 = vpop.f32.mrf.mxu3 }
0x102f   : > { %v1251_v25 = vadd.f32 %v2031_v34, %v1250_v32 }
0x1031   : > { %v1260_v38 = vsel %vm354_vm0, %v1251_v25, -inf }
0x1032   : > { %1261 = vmax.xlane.f32.xlu1 %v1260_v38 }
0x1036   : > { %v1252_v24 = vpop.f32.mrf.mxu3 }
0x1037   : > { %v1253_v40 = vadd.f32 %v2032_v51, %v1252_v24 }
0x1039   : > { %v1263_v52 = vsel %vm354_vm0, %v1253_v40, -inf }
0x103a   : > { %1264 = vmax.xlane.f32.xlu0 %v1263_v52  ;;  %v1880_v52 = vld [vmem:[%s2849_s4 + $0x58] sm:$0xf0] }
0x103e   : > { %v1255_v26 = vpop.f32.mrf.mxu3 }
0x103f   : > { %v1256_v59 = vadd.f32 %v2033_v41, %v1255_v26  ;;  %v1809_v41 = vld [vmem:[%s2849_s4 + $0x38] sm:$0xf] }
0x1041   : > { %v1266_v58 = vsel %vm354_vm0, %v1256_v59, -inf }
0x1042   : > { %1267 = vmax.xlane.f32.xlu2 %v1266_v58 }
0x1046   : > { %v1257_v42 = vpop.f32.mrf.mxu3 }
0x1047   : > { %v1258_v48 = vadd.f32 %v2034_v46, %v1257_v42 }
0x1049   : > { %v1269_v30 = vsel %vm354_vm0, %v1258_v48, -inf }
0x104a   : > { %1270 = vmax.xlane.f32.xlu2 %v1269_v30 }
0x104b   : > { %1310 = vrot.lane.b32.xlu1 %v1228_v53, %s2210_s9 }
0x104e   : > { %1308 = vrot.lane.b32.xlu0 %v1227_v54, %s2210_s9 }
0x1053   : > { %1343 = vrot.lane.b32.xlu1 %v2709_v17, %s2206_s7 }
0x105b   : > { %1400 = vrot.lane.b32.xlu1 %v2691_v45, %s2210_s9 }
0x10a5   : > { %v1262_v1 = vpop.xlane.xlu1 %1261 }
0x10a6   : > { %v1272_v33 = vsub.f32 %v1251_v25, %v1262_v1 }
0x10a8   : > { %v1276_v57 = vmul.f32 1.442695, %v1272_v33 }
0x10aa   : > { %2007 = vpow2.f32 %v1276_v57 }
0x10ad   : > { %v1265_v47 = vpop.xlane.xlu0 %1264 }
0x10ae   : > { %v1273_v60 = vsub.f32 %v1253_v40, %v1265_v47  ;;  %v1813_v40 = vld [vmem:[%s2849_s4 + $0x50] sm:$0xf] }
0x10af   : > { %v1814_v26 = vor.u32 %v1880_v52, %v1813_v40  ;;  %v1844_v40 = vld [vmem:[%s2848_s3] sm:$0xf]  ;;  %v1856_v52 = vld [vmem:[%s2848_s3 + $0x8] sm:$0xf0] }
0x10b0   : > { %v2008_v61 = vpop.eup %2007  ;;  %v1278_v62 = vmul.f32 1.442695, %v1273_v60 }
0x10b1   : > { %v1284_v63 = vsel %vm354_vm0, %v2008_v61, 0.0  ;;  %1402 = vrot.lane.b32.xlu1 %v1814_v26, %s2210_s9  ;;  %v1845_v26 = vor.u32 %v1856_v52, %v1844_v40 }
0x10b2   : > { %2009 = vpow2.f32 %v1278_v62  ;;  %1285 = vadd.xlane.f32.xlu2 %v1284_v63  ;;  %v336_v63 = vld [vmem:[#allocation7 + $0x40] sm:$0xff] }
0x10b5   : > { %v1268_v0 = vpop.xlane.xlu2 %1267 }
0x10b6   : > { %v1274_v6 = vsub.f32 %v1256_v59, %v1268_v0  ;;  %v1877_v59 = vld [vmem:[%s2849_s4 + $0x40] sm:$0xf0] }
0x10b7   : > { %v1810_v58 = vor.u32 %v1877_v59, %v1809_v41 }
0x10b8   : > { %v2010_v2 = vpop.eup %2009  ;;  %v1280_v56 = vmul.f32 1.442695, %v1274_v6 }
0x10b9   : > { %v1287_v10 = vsel %vm354_vm0, %v2010_v2, 0.0  ;;  %1398 = vrot.lane.b32.xlu1 %v1810_v58, %s2210_s9 }
0x10ba   : > { %2011 = vpow2.f32 %v1280_v56  ;;  %1288 = vadd.xlane.f32.xlu2 %v1287_v10 }
0x10bd   : > { %v1271_v3 = vpop.xlane.xlu2 %1270  ;;  %v1311_v4 = vpop.permute.xlu1 %1310 }
0x10be   : > { %v1275_v5 = vsub.f32 %v1258_v48, %v1271_v3  ;;  %1326 = vmatpush.bf16.msrb.mxu0 %v1311_v4 }
0x10c0   : > { %v2012_v7 = vpop.eup %2011  ;;  %v1282_v8 = vmul.f32 1.442695, %v1275_v5  ;;  %v1309_v9 = vpop.permute.xlu0 %1308  ;;  %v1884_v5 = vld [vmem:[%s2850_s5 + $0x38] sm:$0xff] }
0x10c1   : > { %v1290_v29 = vsel %vm354_vm0, %v2012_v7, 0.0 }
0x10c2   : > { %2013 = vpow2.f32 %v1282_v8  ;;  %1291 = vadd.xlane.f32.xlu2 %v1290_v29  ;;  %1327 = vmatpush.bf16.msrb.mxu0 %v1309_v9  ;;  %v1882_v8 = vld [vmem:[%s2850_s5 + $0x28] sm:$0xff] }
0x10c5   : > { %v1344_v37 = vpop.permute.xlu1 %1343 }
0x10c8   : > { %v2014_v11 = vpop.eup %2013 }
0x10c9   : > { %v1293_v12 = vsel %vm354_vm0, %v2014_v11, 0.0 }
0x10ca   : > { %1294 = vadd.xlane.f32.xlu2 %v1293_v12 }
0x10cd   : > { %v1401_v49 = vpop.permute.xlu1 %1400 }
0x10e2   : > { %1345 = vrot.lane.b32.xlu2 %v2691_v45, %s2206_s7 }
0x10ea   : > { %1396 = vrot.lane.b32.xlu2 %v2709_v17, %s2210_s9 }
0x1123   : > { %v1403_v50 = vpop.permute.xlu1 %1402 }
0x1124   : > { %v1405_v30 = vsel %vm720_vm14, %v1401_v49, %v1403_v50  ;;  %v2035_v50 = vld [vmem:[#allocation7 + $0x38] sm:$0xff] }
0x1125   : > { %v1286_v13 = vpop.xlane.xlu2 %1285  ;;  %1417 = vmatpush.bf16.msrb.mxu2 %v1405_v30  ;;  %v1517_v30 = vperm.slane %v2035_v50, 4 }
0x1126   : > { %2015 = vrcp.f32 %v1286_v13 }
0x112b   : > { %v1399_v54 = vpop.permute.xlu1 %1398 }
0x112c   : > { %v2016_v14 = vpop.eup %2015 }
0x112d   : > { %v1289_v36 = vpop.xlane.xlu2 %1288  ;;  %v1300_v16 = vmul.f32 %v2016_v14, %v2008_v61 }
0x112e   : > { %2017 = vrcp.f32 %v1289_v36  ;;  %v1881_v36 = vld [vmem:[%s2850_s5 + $0x20] sm:$0xff] }
0x1134   : > { %v2018_v35 = vpop.eup %2017 }
0x1135   : > { %v1301_v18 = vmul.f32 %v2018_v35, %v2010_v2  ;;  %v1292_v20 = vpop.xlane.xlu2 %1291  ;;  %v1383_v2 = vperm.slane %v336_v63, 0 }
0x1136   : > { %2019 = vrcp.f32 %v1292_v20 }
0x1137   : > { %v1304_v21 = vpack.c.bf16 %v1301_v18, %v1300_v16 }
0x1139   : > { %1804 = vmatmul.msk.bf16.vlgmr.msrb.gmra.mxu0 %vm354_vm0, %v1304_v21 }
0x113c   : > { %v2020_v23 = vpop.eup %2019 }
0x113d   : > { %v1295_v22 = vpop.xlane.xlu2 %1294  ;;  %v1302_v55 = vmul.f32 %v2020_v23, %v2012_v7  ;;  %v1883_v7 = vld [vmem:[%s2850_s5 + $0x30] sm:$0xff] }
0x113e   : > { %2021 = vrcp.f32 %v1295_v22 }
0x1144   : > { %v2022_v45 = vpop.eup %2021 }
0x1145   : > { %v1303_v19 = vmul.f32 %v2022_v45, %v2014_v11  ;;  %v1346_v27 = vpop.permute.xlu2 %1345 }
0x1146   : > { %1358 = vmatpush.bf16.msrb.mxu1 %v1346_v27 }
0x1147   : > { %v1305_v17 = vpack.c.bf16 %v1303_v19, %v1302_v55 }
0x1149   : > { %1805 = vmatmul.msk.bf16.gmra.mxu0 %vm354_vm0, %v1305_v17 }
0x114a   : > { %1359 = vmatpush.bf16.msrb.mxu1 %v1344_v37 }
0x114d   : > { %v1397_v53 = vpop.permute.xlu2 %1396 }
0x114e   : > { %v1404_v1 = vsel %vm720_vm14, %v1397_v53, %v1399_v54  ;;  %1490 = vmatpush.bf16.msra.mxu1 %v1884_v5 }
0x114f   : > { %1418 = vmatpush.bf16.msrb.mxu2 %v1404_v1 }
0x1152   : > { %1491 = vmatpush.bf16.msra.mxu1 %v1883_v7 }
0x1156   : > { %1492 = vmatpush.bf16.msra.mxu1 %v1882_v8 }
0x115a   : > { %1493 = vmatpush.bf16.msra.mxu1 %v1881_v36 }
0x11b6   : > { %v1329_v28 = vpop.f32.mrf.mxu0 }
0x11be   : > { %v1331_v31 = vpop.f32.mrf.mxu0 }
0x11bf   : > { %v1339_v34 = vadd.f32 %v1331_v31, %v1329_v28 }
0x11c6   : > { %v1334_v32 = vpop.f32.mrf.mxu0 }
0x11c7   : > { %v1340_v25 = vadd.f32 %v1339_v34, %v1334_v32 }
0x11ce   : > { %v1336_v38 = vpop.f32.mrf.mxu0 }
0x11cf   : > { %v1341_v24 = vadd.f32 %v1340_v25, %v1336_v38  ;;  %v1848_v38 = vld [vmem:[%s2848_s3 + $0x18] sm:$0xf] }
0x11d1   : > { %v1342_v51 = vpack.c.bf16 %v1341_v24, %v1341_v24  ;;  %v1859_v24 = vld [vmem:[%s2848_s3 + $0x20] sm:$0xf0] }
0x11d3   : > { %1806 = vmatmul.msk.bf16.vlgmr.msrb.gmra.mxu1 %vm354_vm0, %v1342_v51  ;;  %v1849_v51 = vor.u32 %v1859_v24, %v1848_v38 }
0x11d5   : > { %1537 = vmatpush.bf16.msra.mxu2 %v1849_v51 }
0x11d9   : > { %1538 = vmatpush.bf16.msra.mxu2 %v1845_v26 }
0x1250   : > { %v1361_v43 = vpop.f32.mrf.mxu1 }
0x1251   : > { %v2771_v44 = vadd.f32 %v1361_v43, %v2677_v39 }
0x1253   : > { %v1366_v42 = vmul.f32 %v2771_v44, %v2771_v44 }
0x1255   : > { %v1367_v46 = vsel %vm354_vm0, %v1366_v42, 0.0 }
0x1256   : > { %1368 = vadd.xlane.f32.xlu0 %v1367_v46 }
0x1258   : > { %v1363_v48 = vpop.f32.mrf.mxu1 }
0x12c9   : > { %v1369_v33 = vpop.xlane.xlu0 %1368 }
0x12ca   : > { %v1370_v39 = vmul.f32 %v1369_v33, %v2413_v15 }
0x12cc   : > { %v1371_v57 = vadd.f32 1e-06, %v1370_v39 }
0x12ce   : > { %2023 = vrsqrt.f32 %v1371_v57  ;;  %vm1378_vm15 = vweird.f32 %v1371_v57 }
0x12d4   : > { %v2024_v47 = vpop.eup %2023 }
0x12d5   : > { %v1373_v60 = vmul.f32 %v2024_v47, %v1371_v57  ;;  %vm1379_vm13 = vweird.f32 %v2024_v47 }
0x12d6   : > { %vm1380_vm1 = vmor %vm1378_vm15, %vm1379_vm13 }
0x12d7   : > { %v1374_v61 = vmul.f32 %v2024_v47, %v1373_v60 }
0x12d9   : > { %v1375_v62 = vmul.f32 0.5, %v1374_v61 }
0x12db   : > { %v1376_v0 = vsub.f32 1.5, %v1375_v62 }
0x12dd   : > { %v1377_v6 = vmul.f32 %v2024_v47, %v1376_v0 }
0x12df   : > { %v1381_v56 = vsel %vm1380_vm1, %v2024_v47, %v1377_v6 }
0x12e0   : > { %v1382_v10 = vmul.f32 %v1381_v56, %v2771_v44 }
0x12e2   : > { %v1384_v3 = vmul.f32 %v1383_v2, %v1382_v10 }
0x12e4   : > { %v1385_v4 = vpack.c.bf16 %v1384_v3, %v1384_v3 }
0x12e6   : > { %1815 = vmatmul.msk.bf16.vlgmr.msrb.gmra.mxu2 %vm354_vm0, %v1385_v4 }
0x1369   : > { %v1420_v9 = vpop.f32.mrf.mxu2 }
0x136a   : > { %1445 = vrot.lane.b32.xlu2 %v1420_v9, %s2210_s9  ;;  %v1816_v11 = vmul.f32 -1.442695, %v1420_v9 }
0x136c   : > { %2025 = vpow2.f32 %v1816_v11 }
0x1371   : > { %v1422_v29 = vpop.f32.mrf.mxu2 }
0x1372   : > { %v2026_v12 = vpop.eup %2025 }
0x1373   : > { %v1427_v13 = vadd.f32 1.0, %v2026_v12 }
0x1375   : > { %2027 = vrcp.f32 %v1427_v13  ;;  %v1439_v21 = vand.u32 2147483648, %v1427_v13  ;;  %vm1433_vm3 = vweird.f32 %v1427_v13  ;;  %v1437_v22 = vand.u32 2147483647, %v1427_v13 }
0x1377   : > { %v1440_v45 = vor.u32 1.1754944e-38, %v1439_v21  ;;  %vm1438_vm5 = vcmp.eq.f32.partialorder %v1437_v22, 8.507059e+37 }
0x137b   : > { %v2028_v14 = vpop.eup %2027 }
0x137c   : > { %v1429_v35 = vmul.f32 %v2028_v14, %v1427_v13  ;;  %vm1434_vm2 = vweird.f32 %v2028_v14 }
0x137d   : > { %vm1435_vm4 = vmor %vm1433_vm3, %vm1434_vm2 }
0x137e   : > { %v1430_v16 = vsub.f32 1.0, %v1429_v35 }
0x1380   : > { %v1431_v18 = vmul.f32 %v2028_v14, %v1430_v16 }
0x1382   : > { %v1432_v20 = vadd.f32 %v2028_v14, %v1431_v18 }
0x1384   : > { %v1436_v23 = vsel %vm1435_vm4, %v2028_v14, %v1432_v20 }
0x1385   : > { %v1441_v55 = vsel %vm1438_vm5, %v1440_v45, %v1436_v23 }
0x1386   : > { %v1443_v19 = vmul.f32 %v1441_v55, %v1420_v9 }
0x13c4   : > { %v1446_v17 = vpop.permute.xlu2 %1445 }
0x13c5   : > { %v1448_v27 = vmul.f32 %v1446_v17, %v1443_v19 }
0x13c7   : > { %v1449_v37 = vpack.c.bf16 %v1448_v27, %v1448_v27 }
0x13c9   : > { %1841 = vmatmul.msk.bf16.vlgmr.msra.gmra.mxu1 %vm720_vm14, %v1449_v37 }
0x1446   : > { %v1495_v28 = vpop.f32.mrf.mxu1 }
0x1447   : > { %v1499_v31 = vadd.f32 %v1495_v28, %v2771_v44 }
0x1449   : > { %v1500_v32 = vmul.f32 %v1499_v31, %v1499_v31 }
0x144b   : > { %v1501_v34 = vsel %vm354_vm0, %v1500_v32, 0.0 }
0x144c   : > { %1502 = vadd.xlane.f32.xlu1 %v1501_v34 }
0x144e   : > { %v1497_v25 = vpop.f32.mrf.mxu1 }
0x14bf   : > { %v1503_v41 = vpop.xlane.xlu1 %1502 }
0x14c0   : > { %v1504_v59 = vmul.f32 %v1503_v41, %v2413_v15 }
0x14c2   : > { %v1505_v58 = vadd.f32 1e-06, %v1504_v59 }
0x14c4   : > { %2029 = vrsqrt.f32 %v1505_v58  ;;  %vm1512_vm6 = vweird.f32 %v1505_v58 }
0x14ca   : > { %v2030_v43 = vpop.eup %2029 }
0x14cb   : > { %v1507_v44 = vmul.f32 %v2030_v43, %v1505_v58  ;;  %vm1513_vm14 = vweird.f32 %v2030_v43 }
0x14cc   : > { %vm1514_vm7 = vmor %vm1512_vm6, %vm1513_vm14 }
0x14cd   : > { %v1508_v42 = vmul.f32 %v2030_v43, %v1507_v44 }
0x14cf   : > { %v1509_v46 = vmul.f32 0.5, %v1508_v42 }
0x14d1   : > { %v1510_v48 = vsub.f32 1.5, %v1509_v46 }
0x14d3   : > { %v1511_v49 = vmul.f32 %v2030_v43, %v1510_v48 }
0x14d5   : > { %v1515_v53 = vsel %vm1514_vm7, %v2030_v43, %v1511_v49 }
0x14d6   : > { %v1516_v54 = vmul.f32 %v1515_v53, %v1499_v31 }
0x14d8   : > { %v1518_v1 = vmul.f32 %v1517_v30, %v1516_v54 }
0x14da   : > { %v1519_v15 = vpack.c.bf16 %v1518_v1, %v1518_v1 }
0x14dc   : > { %1850 = vmatmul.msk.bf16.vlgmr.msra.gmra.mxu2 %vm354_vm0, %v1519_v15 }
0x155f   : > { %v1540_v33 = vpop.f32.mrf.mxu2 }
0x1560   : > { %1544 = vst [vmem:[%s323_s8] sm:$0xff] %v1540_v33 }
0x1561   : > { %2153 = shalt.err (!%p2150_p8)
}
0x1562   : > { %1893 = dma.vmem_to_hbm [thread:$0]  (%p2310_p0), %s1559_s15, 128, %s1561_s16, %s1546_s20  }
0x1567   : > { %v1542_v39 = vpop.f32.mrf.mxu2 }
0x1568 PF: > { %s1572_s13 = sand.u32 1, %s2188_s21   ;;  %p2869_p10 = scmp.ge.s32.totalorder %s2200_s24, 2 }
0x1569   : > { %s1573_s26 = scalar_lea.sflag [#allocation4], %s1572_s13 }
0x156a   : > { %p1907_p11 = pnand %p2869_p10, %p2318_p6 }
0x156c   : > { %p1908_p12 = pneg %p1907_p11 }
0x156e   : > { %2183 = dma.done.wait (%p1908_p12), %s1573_s26, 128  }
0x156f   : > { %2185 = vsyncadd (%p1908_p12), %s1573_s26, 4294967168  ;;  %s2870_s24 = sld [smem:[#allocation14_spill]]  ;;  %s2873_s21 = smov %s2192_s22 }
0x1570   : > { %s2871_s19 = sld [smem:[#allocation13_spill]] }
0x1571   : > { %s2872_s23 = sld [smem:[#allocation15_spill]] }
0x1575   : > { %p22_p2 = scmp.ge.s32.totalorder %s2870_s24, 4  }
0x1576   : > { %s2874_s22 = smov %s2871_s19 }
0x1577   :  { %24 = sbr.rel (!%p22_p2) target bundleno = 9 (0x9), region = 109 }
0x157c   :  { %1579 = vsyncpa [#allocation3], 1 }
0x157d   :  { %1581 = vsyncpa [#allocation3 + $0x1], 1 }
0x157e   :  { %1582 = vsyncpa [#allocation6], 1 }
0x157f   :  { %1584 = vsyncpa [#allocation6 + $0x1], 1 }
0x1580   :  { %1585 = vsyncpa [#allocation4], 1 }
0x1581   :  { %1587 = vsyncpa [#allocation4 + $0x1], 1 }

</bundles_post_ra>
